<compile_context>
chip_gen: v7x
topology: tpu7x:2x2x1
jax: 0.10.0
libtpu: 0.0.40
codegen_flags: <defaults>
</compile_context>

<pallas_src>
import functools

import numpy as np
import jax
import jax.numpy as jnp
from jax.experimental import pallas as pl
from jax.experimental.pallas import tpu as pltpu


def _round_up(v, m):
    return (v + m - 1) // m * m


def _edgeconv_kernel(win_ref, xc_ref, xn_ref, dst_ref,
                     w1c_ref, w1n_ref, b1_ref, w2_ref, b2_ref,
                     out_ref, *, window, tiles_per_core):
    c = pl.program_id(0)            # per-core output partial (parallel axis)
    e = pl.program_id(1)            # edge tile within this core (arbitrary / reduction axis)
    t = c * tiles_per_core + e      # global edge-tile index

    @pl.when(e == 0)
    def _():
        out_ref[...] = jnp.zeros_like(out_ref)

    # --- 2-layer MLP on the edge tile: bf16 MXU operands, f32 accumulation ---------------
    # cat([xc, xn - xc]) @ W1  ==  xc @ (W1[:F] - W1[F:]) + xn @ W1[F:]
    h = (jnp.dot(xc_ref[...], w1c_ref[...], preferred_element_type=jnp.float32)
         + jnp.dot(xn_ref[...], w1n_ref[...], preferred_element_type=jnp.float32)
         + b1_ref[...])                                                    # (TE, Hp) f32
    h = jnp.maximum(h, 0.0)
    h = jnp.dot(h.astype(jnp.bfloat16), w2_ref[...],
                preferred_element_type=jnp.float32) + b2_ref[...]          # (TE, Hp) f32
    h = jnp.maximum(h, 0.0)

    # --- windowed one-hot scatter-add over the (remapped) destination ids ----------------
    start = pl.multiple_of(win_ref[t], 8)                                  # scalar from SMEM
    dst = dst_ref[0, :]                                                    # (TE,) int32, -1 = pad
    te = dst.shape[0]
    node_ids = start + jax.lax.broadcasted_iota(jnp.int32, (window, te), 0)
    onehot = (node_ids == dst[None, :]).astype(jnp.bfloat16)               # exact in bf16
    upd = jnp.dot(onehot, h.astype(jnp.bfloat16),
                  preferred_element_type=jnp.float32)                      # (W, Hp) f32

    sl = pl.ds(start, window)
    out_ref[sl, :] = out_ref[sl, :] + upd


def build_edge_plan(edge_index, num_nodes, *, te=512, n_cores=2):
    """One-time host-side preprocessing of the *static* edge structure (numpy)."""
    row = np.asarray(jax.device_get(edge_index[0])).astype(np.int64)
    col = np.asarray(jax.device_get(edge_index[1])).astype(np.int64)
    e_total = int(row.shape[0])
    n_pad = max(_round_up(num_nodes, 8), 8)

    # sort edges by destination, densify destination ids: any TE consecutive sorted edges
    # then span at most TE consecutive remapped ids.
    order = np.argsort(row, kind="stable")
    row_s, col_s = row[order], col[order]
    is_new = np.concatenate([[1], (row_s[1:] != row_s[:-1]).astype(np.int64)])
    dense = np.cumsum(is_new) - 1

    # node -> remapped row (nodes without incoming edges get the trailing slots)
    perm = np.full((num_nodes,), -1, np.int64)
    perm[row_s] = dense
    has_edge = perm >= 0
    n_used = int(dense[-1]) + 1
    free_rank = np.cumsum(~has_edge) - 1
    perm = np.where(has_edge, perm, n_used + free_rank).astype(np.int32)

    # pad edge dim to whole tiles; tiles to a multiple of n_cores. Padded edges: dst = -1.
    tiles = max(-(-e_total // te), 1)
    tiles = _round_up(tiles, n_cores)
    e_pad = tiles * te
    dst = np.full((e_pad,), -1, np.int32)
    dst[:e_total] = dense
    dst_tiles = dst.reshape(tiles, te)

    # span-derived static scatter window + 8-aligned per-tile window starts
    valid = dst_tiles >= 0
    min_dst = np.where(valid, dst_tiles, n_pad).min(axis=1)
    max_dst = np.where(valid, dst_tiles, -1).max(axis=1)
    span = int(np.where(max_dst >= 0, max_dst - min_dst + 1, 0).max())
    window = int(min(_round_up(max(span, 1), 8) + 8, n_pad))
    assert n_pad % 8 == 0 and window % 8 == 0 and window <= n_pad
    win_start = np.clip((min_dst // 8) * 8, 0, n_pad - window).astype(np.int32)
    assert np.all(win_start % 8 == 0)                       # validity of pl.multiple_of hint
    assert np.all(np.where(max_dst >= 0, max_dst, 0) <= win_start + window - 1)  # coverage

    # mean normalization factor in *original* node order (applied in the wrapper)
    inv_counts = (1.0 / np.maximum(np.bincount(row, minlength=num_nodes), 1)).astype(np.float32)

    return dict(
        n=num_nodes, n_pad=n_pad, e_total=e_total, e_pad=e_pad,
        te=te, tiles=tiles, n_cores=n_cores, window=window,
        row_s=jnp.asarray(row_s.astype(np.int32)),
        col_s=jnp.asarray(col_s.astype(np.int32)),
        dst_row=jnp.asarray(dst.reshape(1, e_pad)),
        win_start=jnp.asarray(win_start),
        perm=jnp.asarray(perm),
        inv_counts=jnp.asarray(inv_counts[:, None]),
    )


def custom_static_edge_conv(x, params, plan):
    """x: (N, F) f32; params: {'w1','b1','w2','b2'}; plan: build_edge_plan output."""
    n, f = x.shape
    te, tiles, n_cores = plan["te"], plan["tiles"], plan["n_cores"]
    tiles_per_core = tiles // n_cores
    n_pad, window = plan["n_pad"], plan["window"]
    e_total, e_pad = plan["e_total"], plan["e_pad"]

    w1, b1, w2, b2 = params["w1"], params["b1"], params["w2"], params["b2"]
    h_dim = int(w2.shape[1])
    h_pad = _round_up(h_dim, 128)

    # --- endpoint gathers (XLA glue), bf16 stream; xn-xc is folded into the weights -------
    xb = x.astype(jnp.bfloat16)
    pad_e = e_pad - e_total
    xc = jnp.pad(xb[plan["row_s"]], ((0, pad_e), (0, 0)))                  # (E_pad, F) bf16
    xn = jnp.pad(xb[plan["col_s"]], ((0, pad_e), (0, 0)))                  # (E_pad, F) bf16

    # --- lane-pad weights; matmul operands in bf16, biases stay f32 ------------------------
    w1c = jnp.zeros((f, h_pad), jnp.float32).at[:, :h_dim].set(w1[:f] - w1[f:])
    w1n = jnp.zeros((f, h_pad), jnp.float32).at[:, :h_dim].set(w1[f:])
    w2p = jnp.zeros((h_pad, h_pad), jnp.float32).at[:h_dim, :h_dim].set(w2)
    b1p = jnp.zeros((1, h_pad), jnp.float32).at[:, :h_dim].set(b1.reshape(1, -1))
    b2p = jnp.zeros((1, h_pad), jnp.float32).at[:, :h_dim].set(b2.reshape(1, -1))
    w1c = w1c.astype(jnp.bfloat16)
    w1n = w1n.astype(jnp.bfloat16)
    w2p = w2p.astype(jnp.bfloat16)

    # --- generation-aware VMEM budget -------------------------------------------------------
    f_lane = _round_up(max(f, 1), 128)
    vmem_bytes = (
        2 * n_pad * h_pad * 4                                    # per-core output block (x2 buf)
        + 2 * 2 * te * f_lane * 2                                # xc/xn tiles, bf16 (x2 buf each)
        + 2 * 8 * te * 4                                         # dst row tile (x2 buf, sublane pad)
        + 2 * (2 * f * h_pad + h_pad * h_pad) * 2                # bf16 weights (x2 buf)
        + 2 * 2 * 8 * h_pad * 4                                  # f32 biases (x2 buf, sublane pad)
        + window * te * 8                                        # iota / one-hot temporaries
    )
    try:
        vmem_cap = int(pltpu.get_tpu_info().vmem_capacity_bytes)
    except Exception:
        vmem_cap = 64 * 1024 * 1024
    vmem_limit = int(min(max(2 * vmem_bytes, 16 * 1024 * 1024), (3 * vmem_cap) // 4))

    grid_spec = pltpu.PrefetchScalarGridSpec(
        num_scalar_prefetch=1,                                   # per-tile window starts -> SMEM
        grid=(n_cores, tiles_per_core),
        in_specs=[
            pl.BlockSpec((te, f), lambda c, e, ws: (c * tiles_per_core + e, 0)),      # xc
            pl.BlockSpec((te, f), lambda c, e, ws: (c * tiles_per_core + e, 0)),      # xn
            pl.BlockSpec((1, te), lambda c, e, ws: (0, c * tiles_per_core + e)),      # dst ids
            pl.BlockSpec((f, h_pad), lambda c, e, ws: (0, 0)),                        # W1_c
            pl.BlockSpec((f, h_pad), lambda c, e, ws: (0, 0)),                        # W1_n
            pl.BlockSpec((1, h_pad), lambda c, e, ws: (0, 0)),                        # b1
            pl.BlockSpec((h_pad, h_pad), lambda c, e, ws: (0, 0)),                    # W2
            pl.BlockSpec((1, h_pad), lambda c, e, ws: (0, 0)),                        # b2
        ],
        out_specs=pl.BlockSpec((n_pad, h_pad), lambda c, e, ws: (c, 0)),
    )

    out_parts = pl.pallas_call(
        functools.partial(_edgeconv_kernel, window=window, tiles_per_core=tiles_per_core),
        out_shape=jax.ShapeDtypeStruct((n_cores * n_pad, h_pad), jnp.float32),
        grid_spec=grid_spec,
        compiler_params=pltpu.CompilerParams(
            dimension_semantics=("parallel", "arbitrary"),
            vmem_limit_bytes=vmem_limit),
    )(plan["win_start"], xc, xn, plan["dst_row"], w1c, w1n, b1p, w2p, b2p)

    # sum per-core partials, undo the node remapping, strip lane padding, apply mean norm.
    out_sum = out_parts.reshape(n_cores, n_pad, h_pad).sum(axis=0)
    return out_sum[plan["perm"], :h_dim] * plan["inv_counts"]


def _reference(x, edge_index, params):
    """Pure-JAX f32 reference matching the PyTorch forward."""
    row, col = edge_index[0], edge_index[1]
    xc, xn = x[row], x[col]
    ef = jnp.concatenate([xc, xn - xc], axis=-1)
    h = jnp.maximum(ef @ params["w1"] + params["b1"], 0.0)
    h = jnp.maximum(h @ params["w2"] + params["b2"], 0.0)
    n = x.shape[0]
    node_sum = jnp.zeros((n, h.shape[-1]), jnp.float32).at[row].add(h)
    counts = jnp.maximum(jnp.bincount(row, length=n), 1).astype(jnp.float32)[:, None]
    return node_sum / counts


if __name__ == "__main__":
    N, F, H, E = 64, 16, 32, 500   # E not a multiple of the tile -> exercises edge padding

    key = jax.random.PRNGKey(0)
    kx, kr, kc, k1, kb1, k2, kb2 = jax.random.split(key, 7)

    x = jax.random.normal(kx, (N, F), dtype=jnp.float32)
    row = jax.random.randint(kr, (E,), 0, N, dtype=jnp.int32)
    col = jax.random.randint(kc, (E,), 0, N, dtype=jnp.int32)
    edge_index = jnp.stack([row, col], axis=0)

    params = {
        "w1": jax.random.normal(k1, (2 * F, H), dtype=jnp.float32) * 0.1,
        "b1": jax.random.normal(kb1, (H,), dtype=jnp.float32) * 0.01,
        "w2": jax.random.normal(k2, (H, H), dtype=jnp.float32) * 0.1,
        "b2": jax.random.normal(kb2, (H,), dtype=jnp.float32) * 0.01,
    }

    # one-time static-graph preprocessing (hoisted out of the per-call path)
    plan = build_edge_plan(edge_index, N, te=512, n_cores=2)

    out = custom_static_edge_conv(x, params, plan)
    out = jax.block_until_ready(out)

    ref = _reference(x, edge_index, params)
    assert out.shape == (N, H)
    # tolerance loosened vs the all-f32 version: MLP matmul operands are bf16 now
    assert jnp.allclose(out, ref, atol=2e-2, rtol=2e-2), "mismatch vs reference"
    print("KERNEL_OK")
</pallas_src>

<mosaic_0001>
module attributes {stable_mosaic.version = 11 : i64} {
  func.func @_edgeconv_kernel(%arg0: i32, %arg1: i32, %arg2: memref<2xi32, #tpu.memory_space<smem>>, %arg3: memref<512x16xbf16, #tpu.memory_space<vmem>>, %arg4: memref<512x16xbf16, #tpu.memory_space<vmem>>, %arg5: memref<1x512xi32, #tpu.memory_space<vmem>>, %arg6: memref<16x128xbf16, #tpu.memory_space<vmem>>, %arg7: memref<16x128xbf16, #tpu.memory_space<vmem>>, %arg8: memref<1x128xf32, #tpu.memory_space<vmem>>, %arg9: memref<128x128xbf16, #tpu.memory_space<vmem>>, %arg10: memref<1x128xf32, #tpu.memory_space<vmem>>, %arg11: memref<64x128xf32, #tpu.memory_space<vmem>>) attributes {dimension_semantics = [#tpu.dimension_semantics<parallel>, #tpu.dimension_semantics<arbitrary>], iteration_bounds = array<i64: 2, 1>, scalar_prefetch = 1 : i64, scratch_operands = 0 : i64, tpu.core_type = #tpu.core_type<tc>, window_params = [{transform_indices = @transform_0, window_bounds = array<i64: 512, 16>}, {transform_indices = @transform_1, window_bounds = array<i64: 512, 16>}, {transform_indices = @transform_2, window_bounds = array<i64: 1, 512>}, {pipeline_mode = #tpu.pipeline_mode<synchronous>, transform_indices = @transform_3, window_bounds = array<i64: 16, 128>}, {pipeline_mode = #tpu.pipeline_mode<synchronous>, transform_indices = @transform_4, window_bounds = array<i64: 16, 128>}, {pipeline_mode = #tpu.pipeline_mode<synchronous>, transform_indices = @transform_5, window_bounds = array<i64: 1, 128>}, {pipeline_mode = #tpu.pipeline_mode<synchronous>, transform_indices = @transform_6, window_bounds = array<i64: 128, 128>}, {pipeline_mode = #tpu.pipeline_mode<synchronous>, transform_indices = @transform_7, window_bounds = array<i64: 1, 128>}, {transform_indices = @transform_8, window_bounds = array<i64: 64, 128>}]} {
    %c1_i32 = arith.constant 1 : i32
    %0 = arith.muli %arg0, %c1_i32 : i32
    %1 = arith.addi %0, %arg1 : i32
    %c0_i32 = arith.constant 0 : i32
    %2 = arith.cmpi eq, %arg1, %c0_i32 : i32
    %3 = arith.extui %2 : i1 to i32
    %c0_i32_0 = arith.constant 0 : i32
    %4 = arith.cmpi ne, %3, %c0_i32_0 : i32
    scf.if %4 {
      %cst_23 = arith.constant 0.000000e+00 : f32
      %46 = vector.broadcast %cst_23 : f32 to vector<64x128xf32>
      %c0_24 = arith.constant 0 : index
      %c0_25 = arith.constant 0 : index
      %47 = vector.load %arg11[%c0_24, %c0_25] : memref<64x128xf32, #tpu.memory_space<vmem>>, vector<64x128xf32>
      tpu.vector_store %arg11[%c0_24, %c0_25], %46 {strides = array<i32>} : memref<64x128xf32, #tpu.memory_space<vmem>>, vector<64x128xf32>,
    } else {
    }
    %c0 = arith.constant 0 : index
    %c0_1 = arith.constant 0 : index
    %5 = vector.load %arg3[%c0, %c0_1] : memref<512x16xbf16, #tpu.memory_space<vmem>>, vector<512x16xbf16>
    %c0_2 = arith.constant 0 : index
    %c0_3 = arith.constant 0 : index
    %6 = vector.load %arg6[%c0_2, %c0_3] : memref<16x128xbf16, #tpu.memory_space<vmem>>, vector<16x128xbf16>
    %cst = arith.constant dense<0.000000e+00> : vector<512x128xf32>
    %7 = tpu.matmul %5, %6, %cst {dimension_numbers = #tpu.dot_dimension_numbers<[1], [0], [0], [1], [0, 0, 1, 1], [], []>} : vector<512x16xbf16>, vector<16x128xbf16>, vector<512x128xf32> -> vector<512x128xf32>
    %c0_4 = arith.constant 0 : index
    %c0_5 = arith.constant 0 : index
    %8 = vector.load %arg4[%c0_4, %c0_5] : memref<512x16xbf16, #tpu.memory_space<vmem>>, vector<512x16xbf16>
    %c0_6 = arith.constant 0 : index
    %c0_7 = arith.constant 0 : index
    %9 = vector.load %arg7[%c0_6, %c0_7] : memref<16x128xbf16, #tpu.memory_space<vmem>>, vector<16x128xbf16>
    %cst_8 = arith.constant dense<0.000000e+00> : vector<512x128xf32>
    %10 = tpu.matmul %8, %9, %cst_8 {dimension_numbers = #tpu.dot_dimension_numbers<[1], [0], [0], [1], [0, 0, 1, 1], [], []>} : vector<512x16xbf16>, vector<16x128xbf16>, vector<512x128xf32> -> vector<512x128xf32>
    %11 = arith.addf %7, %10 : vector<512x128xf32>
    %c0_9 = arith.constant 0 : index
    %c0_10 = arith.constant 0 : index
    %12 = vector.load %arg8[%c0_9, %c0_10] : memref<1x128xf32, #tpu.memory_space<vmem>>, vector<1x128xf32>
    %13 = vector.broadcast %12 : vector<1x128xf32> to vector<512x128xf32>
    %14 = arith.addf %11, %13 : vector<512x128xf32>
    %cst_11 = arith.constant 0.000000e+00 : f32
    %15 = vector.broadcast %cst_11 : f32 to vector<512x128xf32>
    %16 = arith.maximumf %14, %15 : vector<512x128xf32>
    %17 = arith.truncf %16 : vector<512x128xf32> to vector<512x128xbf16>
    %c0_12 = arith.constant 0 : index
    %c0_13 = arith.constant 0 : index
    %18 = vector.load %arg9[%c0_12, %c0_13] : memref<128x128xbf16, #tpu.memory_space<vmem>>, vector<128x128xbf16>
    %cst_14 = arith.constant dense<0.000000e+00> : vector<512x128xf32>
    %19 = tpu.matmul %17, %18, %cst_14 {dimension_numbers = #tpu.dot_dimension_numbers<[1], [0], [0], [1], [0, 0, 1, 1], [], []>} : vector<512x128xbf16>, vector<128x128xbf16>, vector<512x128xf32> -> vector<512x128xf32>
    %c0_15 = arith.constant 0 : index
    %c0_16 = arith.constant 0 : index
    %20 = vector.load %arg10[%c0_15, %c0_16] : memref<1x128xf32, #tpu.memory_space<vmem>>, vector<1x128xf32>
    %21 = vector.broadcast %20 : vector<1x128xf32> to vector<512x128xf32>
    %22 = arith.addf %19, %21 : vector<512x128xf32>
    %cst_17 = arith.constant 0.000000e+00 : f32
    %23 = vector.broadcast %cst_17 : f32 to vector<512x128xf32>
    %24 = arith.maximumf %22, %23 : vector<512x128xf32>
    %25 = arith.index_cast %1 : i32 to index
    %26 = memref.load %arg2[%25] : memref<2xi32, #tpu.memory_space<smem>>
    %27 = tpu.assume_multiple %26, 8 : i32
    %c0_18 = arith.constant 0 : index
    %c0_19 = arith.constant 0 : index
    %28 = vector.load %arg5[%c0_18, %c0_19] : memref<1x512xi32, #tpu.memory_space<vmem>>, vector<1x512xi32>
    %29 = vector.shape_cast %28 : vector<1x512xi32> to vector<512xi32>
    %30 = tpu.iota {dimensions = array<i32: 0>} : vector<64x512xi32>
    %31 = vector.broadcast %27 : i32 to vector<64x512xi32>
    %32 = arith.addi %31, %30 : vector<64x512xi32>
    %33 = vector.shape_cast %29 : vector<512xi32> to vector<1x512xi32>
    %34 = vector.broadcast %33 : vector<1x512xi32> to vector<64x512xi32>
    %35 = arith.cmpi eq, %32, %34 : vector<64x512xi32>
    %36 = arith.extui %35 : vector<64x512xi1> to vector<64x512xi32>
    %37 = arith.sitofp %36 : vector<64x512xi32> to vector<64x512xf32>
    %38 = arith.truncf %37 : vector<64x512xf32> to vector<64x512xbf16>
    %39 = arith.truncf %24 : vector<512x128xf32> to vector<512x128xbf16>
    %cst_20 = arith.constant dense<0.000000e+00> : vector<64x128xf32>
    %40 = tpu.matmul %38, %39, %cst_20 {dimension_numbers = #tpu.dot_dimension_numbers<[1], [0], [0], [1], [0, 0, 1, 1], [], []>} : vector<64x512xbf16>, vector<512x128xbf16>, vector<64x128xf32> -> vector<64x128xf32>
    %41 = arith.index_cast %27 : i32 to index
    %c0_21 = arith.constant 0 : index
    %42 = vector.load %arg11[%41, %c0_21] : memref<64x128xf32, #tpu.memory_space<vmem>>, vector<64x128xf32>
    %43 = arith.addf %42, %40 : vector<64x128xf32>
    %44 = arith.index_cast %27 : i32 to index
    %c0_22 = arith.constant 0 : index
    %45 = vector.load %arg11[%44, %c0_22] : memref<64x128xf32, #tpu.memory_space<vmem>>, vector<64x128xf32>
    tpu.vector_store %arg11[%44, %c0_22], %43 {strides = array<i32>} : memref<64x128xf32, #tpu.memory_space<vmem>>, vector<64x128xf32>,
    return
  }
  func.func @transform_0(%arg0: i32, %arg1: i32, %arg2: memref<2xi32, #tpu.memory_space<smem>>) -> (i32, i32) {
    %c1_i32 = arith.constant 1 : i32
    %0 = arith.muli %arg0, %c1_i32 : i32
    %1 = arith.addi %0, %arg1 : i32
    %c0_i32 = arith.constant 0 : i32
    %c0_i32_0 = arith.constant 0 : i32
    return %1, %c0_i32 : i32, i32
  }
  func.func @transform_1(%arg0: i32, %arg1: i32, %arg2: memref<2xi32, #tpu.memory_space<smem>>) -> (i32, i32) {
    %c1_i32 = arith.constant 1 : i32
    %0 = arith.muli %arg0, %c1_i32 : i32
    %1 = arith.addi %0, %arg1 : i32
    %c0_i32 = arith.constant 0 : i32
    %c0_i32_0 = arith.constant 0 : i32
    return %1, %c0_i32 : i32, i32
  }
  func.func @transform_2(%arg0: i32, %arg1: i32, %arg2: memref<2xi32, #tpu.memory_space<smem>>) -> (i32, i32) {
    %c1_i32 = arith.constant 1 : i32
    %0 = arith.muli %arg0, %c1_i32 : i32
    %1 = arith.addi %0, %arg1 : i32
    %c0_i32 = arith.constant 0 : i32
    %c0_i32_0 = arith.constant 0 : i32
    return %c0_i32, %1 : i32, i32
  }
  func.func @transform_3(%arg0: i32, %arg1: i32, %arg2: memref<2xi32, #tpu.memory_space<smem>>) -> (i32, i32) {
    %c0_i32 = arith.constant 0 : i32
    %c0_i32_0 = arith.constant 0 : i32
    %c0_i32_1 = arith.constant 0 : i32
    return %c0_i32, %c0_i32_0 : i32, i32
  }
  func.func @transform_4(%arg0: i32, %arg1: i32, %arg2: memref<2xi32, #tpu.memory_space<smem>>) -> (i32, i32) {
    %c0_i32 = arith.constant 0 : i32
    %c0_i32_0 = arith.constant 0 : i32
    %c0_i32_1 = arith.constant 0 : i32
    return %c0_i32, %c0_i32_0 : i32, i32
  }
  func.func @transform_5(%arg0: i32, %arg1: i32, %arg2: memref<2xi32, #tpu.memory_space<smem>>) -> (i32, i32) {
    %c0_i32 = arith.constant 0 : i32
    %c0_i32_0 = arith.constant 0 : i32
    %c0_i32_1 = arith.constant 0 : i32
    return %c0_i32, %c0_i32_0 : i32, i32
  }
  func.func @transform_6(%arg0: i32, %arg1: i32, %arg2: memref<2xi32, #tpu.memory_space<smem>>) -> (i32, i32) {
    %c0_i32 = arith.constant 0 : i32
    %c0_i32_0 = arith.constant 0 : i32
    %c0_i32_1 = arith.constant 0 : i32
    return %c0_i32, %c0_i32_0 : i32, i32
  }
  func.func @transform_7(%arg0: i32, %arg1: i32, %arg2: memref<2xi32, #tpu.memory_space<smem>>) -> (i32, i32) {
    %c0_i32 = arith.constant 0 : i32
    %c0_i32_0 = arith.constant 0 : i32
    %c0_i32_1 = arith.constant 0 : i32
    return %c0_i32, %c0_i32_0 : i32, i32
  }
  func.func @transform_8(%arg0: i32, %arg1: i32, %arg2: memref<2xi32, #tpu.memory_space<smem>>) -> (i32, i32) {
    %c0_i32 = arith.constant 0 : i32
    %c0_i32_0 = arith.constant 0 : i32
    return %arg0, %c0_i32 : i32, i32
  }
}

</mosaic_0001>

<bundles_post_ra>
// kernel: tpu_custom_call.1
= control target key start
LH: loop header
LB: loop body
LE: loop exit
PB: predicated region body
PF: predicated region fallthrough
CT: control target
= control target key end

     0   :  { %s4381_s0 = inlined_call_operand.vmem [shape: s32[2], index: 0, kind: input, shape index: {}]   ;;  %s4382_s1 = inlined_call_operand.vmem [shape: bf16[1024,16], index: 1, kind: input, shape index: {}]   ;;  %s4383_s2 = inlined_call_operand.vmem [shape: bf16[1024,16], index: 2, kind: input, shape index: {}]   ;;  %s4384_s3 = inlined_call_operand.vmem [shape: s32[1,1024], index: 3, kind: input, shape index: {}]   ;;  %s4385_s4 = inlined_call_operand.vmem [shape: bf16[16,128], index: 4, kind: input, shape index: {}]   ;;  %s4386_s5 = inlined_call_operand.vmem [shape: bf16[16,128], index: 5, kind: input, shape index: {}]   ;;  %s4387_s6 = inlined_call_operand.vmem [shape: f32[1,128], index: 6, kind: input, shape index: {}]   ;;  %s4388_s7 = inlined_call_operand.vmem [shape: bf16[128,128], index: 7, kind: input, shape index: {}]   ;;  %s4389_s8 = inlined_call_operand.vmem [shape: f32[1,128], index: 8, kind: input, shape index: {}]   ;;  %s4390_s9 = inlined_call_operand.hbm [shape: f32[128,128], index: 9, kind: output, shape index: {}]  }
   0x1   :  { %s14_s11 = sshll.u32 %s4381_s0, 4  ;;  %s15_s11 = int_to_ptr.vmem [resolvable:$true] %s14_s11 }
   0x2   :  { %s3488_s12 = scalar_lea.vmem %s15_s11, 16  ;;  %p3493_p1 = scmp.lt.s32.totalorder %s15_s11, %s15_s11 }
   0x3   :  { %p3489_p0 = scmp.ne.s32.totalorder %s15_s11, %s3488_s12  ;;  %p3494_p2 = scmp.lt.s32.totalorder %s3488_s12, %s3488_s12 }
   0x5   :  { %p3495_p3 = por %p3494_p2, %p3493_p1 }
   0x7   :  { %p3496_p4 = pnand %p3495_p3, %p3489_p0 }
   0x9   :  { %3499 = shalt.err (!%p3496_p4)  }
   0xa   :  { %s3582_s13 = smov [#allocation3]  }
   0xb   :  { %17 = dma.vmem_to_smem %s15_s11, 16, %s3582_s13, [#allocation2] }
   0xc   :  { %3552 = dma.done.wait [#allocation2], 16 }
   0xd   :  { %3553 = vsyncadd [#allocation2], 4294967280 }
   0xe   :  { %19 = sfence }
   0xf   :  { %20 = vsyncpa [#allocation5], 0 }
  0x10   :  { %22 = vsyncpa [#allocation5 + $0x1], 0  ;;  %s3641_s14 = smov 0   ;;  %s3643_s15 = smov 0  }
  0x11   :  { %s3645_s0 = smov 0   ;;  %s3647_s16 = smov 0  }
  0x12   :  { %s3649_s17 = smov 0   ;;  %s3651_s18 = smov 0  }
  0x13 LB: > { %s2669_s19 = sadd.s32 4294967295, %s3580_s18   ;;  %s2670_s20 = sadd.s32 4294967294, %s3580_s18   ;;  %s3580_s18 = sphi %s3651_s18, %s28_s18   ;;  %s3576_s17 = sphi %s3649_s17, %s4430_s17   ;;  %s3572_s16 = sphi %s3647_s16, %s4429_s16   ;;  %s3568_s0 = sphi %s3645_s0, %s4428_s0   ;;  %s3564_s15 = sphi %s3643_s15, %s4427_s15   ;;  %s3560_s14 = sphi %s3641_s14, %s4426_s14  }
  0x14   : > { %s40_s21 = sadd.s32 1, %s3576_s17  ;;  %s236_s22 = sadd.s32 1, %s3568_s0 }
  0x15   : > { %p42_p5 = scmp.ge.s32.totalorder %s40_s21, 2  ;;  %p246_p6 = scmp.ne.s32.totalorder %s3568_s0, %s3564_s15 }
  0x16   : > { %p247_p7 = scmp.eq.s32.totalorder %s2669_s19, 1  ;;  %p252_p8 = scmp.ne.s32.totalorder %s3564_s15, %s3560_s14 }
  0x17   : > { %s4432_s21 = smov (%p42_p5, %s40_s21), 0  ;;  %p253_p10 = scmp.eq.s32.totalorder %s2670_s20, 1 }
  0x18   : > { %p3681_p9 = por %p247_p7, %p246_p6  ;;  %s233_s24 = ssub.s32 %s3576_s17, %s4432_s21 }
  0x19   : > { %p2673_p11 = scmp.ge.s32.totalorder %s3580_s18, 1  ;;  %p234_p12 = scmp.eq.s32.totalorder %s233_s24, 0 }
  0x1a   : > { %p3688_p13 = por %p253_p10, %p252_p8  ;;  %p318_p0 = scmp.lt.s32.totalorder %s3580_s18, 3 }
  0x1b   : > { %s3694_s26 = scalar_select %p234_p12, %s3568_s0, %s236_s22  }
  0x1c   : > { %p319_p1 = pnand %p2673_p11, %p318_p0 }
  0x1d   : > { %v3414_v0 = vld [vmem:[%s4386_s5] sm:$0xff] (!%p319_p1)   ;;  %s2675_s29 = sshll.u32 (!%p319_p1), %s3572_s16, 6  ;;  %vm700_vm0 = vcmask (!%p319_p1), 130048   ;;  %v3481_v36 = vld [vmem:[%s4388_s7 + $0x8] sm:$0xff] (!%p319_p1)   ;;  %v3482_v38 = vld [vmem:[%s4388_s7 + $0x10] sm:$0xff] (!%p319_p1)   ;;  %s2679_s12 = sshll.u32 (!%p319_p1), %s3572_s16, 2 }
  0x1e   : > { %322 = sbr.rel (%p319_p1) target bundleno = 971 (0x3cb), region = 52  ;;  %p366_p2 = scmp.lt.s32.totalorder (!%p319_p1), %s2675_s29, 127  ;;  %3076 = vmatprep.subr.bf16.mxu0 (!%p319_p1), %v3414_v0  ;;  %v3431_v1 = vld [vmem:[%s4385_s4] sm:$0xff] (!%p319_p1)   ;;  %3288 = vmatprep.subr.bf16.mxu1 (!%p319_p1), %v3414_v0  ;;  %v3483_v40 = vld [vmem:[%s4388_s7 + $0x18] sm:$0xff] (!%p319_p1)   ;;  %v3485_v44 = vld [vmem:[%s4388_s7 + $0x28] sm:$0xff] (!%p319_p1)  }
  0x1f   : > { %3077 = vmatpush3.bf16.msra.mxu0 (!%p319_p1), %v3414_v0  ;;  %3289 = vmatpush3.bf16.msra.mxu1 (!%p319_p1), %v3414_v0  ;;  %v3480_v35 = vld [vmem:[%s4388_s7] sm:$0xff] (!%p319_p1)   ;;  %v3486_v0 = vld [vmem:[%s4388_s7 + $0x30] sm:$0xff] (!%p319_p1)   ;;  %s3984_s13 = sld [smem:[#allocation3 + %s3572_s16]] (!%p319_p1)  ;;  %p382_p3 = scmp.lt.s32.totalorder (!%p319_p1), %s2679_s12, 7 }
  0x20   : > { %3142 = vmatprep.subr.bf16.mxu0 (!%p319_p1), %v3431_v1  ;;  %3208 = vmatprep.subr.bf16.mxu1 (!%p319_p1), %v3480_v35  ;;  %v3484_v42 = vld [vmem:[%s4388_s7 + $0x20] sm:$0xff] (!%p319_p1)   ;;  %s3585_s27 = smov (!%p319_p1), [#allocation4]  }
  0x21   : > { %s3504_s28 = sshll.u32 (!%p319_p1), %s3585_s27, 4  ;;  %s3505_s28 = int_to_ptr.vmem [resolvable:$false] %s3504_s28 }
  0x25   : > { %s4434_s29 = smov (!%p366_p2, %s2675_s29), 127  ;;  %s4436_s12 = smov (!%p382_p3, %s2679_s12), 7 }
  0x26   : > { %s2676_s11 = sshll.u32 %s4434_s29, 2  ;;  %s384_s22 = scalar_lea.vmem %s4384_s3, %s4436_s12 }
  0x27   : > { %s3706_s19 = scalar_lea.vmem %s4383_s2, %s2676_s11  ;;  %s3725_s24 = scalar_lea.vmem %s4382_s1, %s2676_s11 }
  0x28   : > { %v3415_v2 = vld [vmem:[%s3706_s19] sm:$0xff]   ;;  %v3416_v3 = vld [vmem:[%s3706_s19 + $0x8] sm:$0xff]   ;;  %v3417_v4 = vld [vmem:[%s3706_s19 + $0x10] sm:$0xff]   ;;  %s361_s29 = sand.u32 1, %s3564_s15   ;;  %s2889_s11 = sshll.u32 %s3572_s16, 10 }
  0x29   : > { %3078 = vmatprep.mubr.msk.bf16.mxu0 %vm700_vm0, %v3415_v2  ;;  %v3418_v5 = vld [vmem:[%s3706_s19 + $0x18] sm:$0xff]   ;;  %v3419_v6 = vld [vmem:[%s3706_s19 + $0x20] sm:$0xff]   ;;  %v3420_v7 = vld [vmem:[%s3706_s19 + $0x28] sm:$0xff]   ;;  %s2674_s30 = sshll.u32 %s361_s29, 6  ;;  %s4327_s20 = scalar_lea.hbm %s4390_s9, %s2889_s11 }
  0x2a   : > { %3079 = vmatmul.mubr.msk.bf16.vlgmr.msra.gmra.mrb[0].mxu0 %vm700_vm0, %v3416_v3  ;;  %v3421_v8 = vld [vmem:[%s3706_s19 + $0x30] sm:$0xff]   ;;  %v3422_v9 = vld [vmem:[%s3706_s19 + $0x38] sm:$0xff]   ;;  %v3423_v10 = vld [vmem:[%s3706_s19 + $0x40] sm:$0xff]   ;;  %s4294_s10 = scalar_lea.vmem [#allocation4], %s2674_s30  ;;  %s3506_s30 = scalar_lea.vmem %s3505_s28, 2048 }
  0x2b   : > { %3082 = vmatprep.mubr.msk.bf16.mxu0 %vm700_vm0, %v3417_v4  ;;  %3143 = vmatpush3.bf16.msra.mxu0 %v3431_v1  ;;  %v3424_v11 = vld [vmem:[%s3706_s19 + $0x48] sm:$0xff]   ;;  %v3425_v12 = vld [vmem:[%s3706_s19 + $0x50] sm:$0xff]   ;;  %v3426_v13 = vld [vmem:[%s3706_s19 + $0x58] sm:$0xff]   ;;  %s2577_s12 = sshll.u32 %s4294_s10, 4  ;;  %s4329_s12 = int_to_ptr.vmem [resolvable:$true] %s2577_s12 }
  0x2c   : > { %v3427_v14 = vld [vmem:[%s3706_s19 + $0x60] sm:$0xff]   ;;  %v3428_v15 = vld [vmem:[%s3706_s19 + $0x68] sm:$0xff]   ;;  %v3429_v16 = vld [vmem:[%s3706_s19 + $0x70] sm:$0xff]   ;;  %s3500_s16 = scalar_lea.vmem %s4329_s12, 1024  ;;  %p3507_p7 = scmp.lt.s32.totalorder %s4329_s12, %s3505_s28 }
  0x2d   : > { %v3430_v17 = vld [vmem:[%s3706_s19 + $0x78] sm:$0xff]   ;;  %v3432_v18 = vld [vmem:[%s3706_s19 + $0x80] sm:$0xff]   ;;  %v3466_v20 = vld [vmem:[%s3706_s19 + $0xc8] sm:$0xff]   ;;  %p3501_p4 = scmp.ne.s32.totalorder %s4329_s12, %s3500_s16  ;;  %p3508_p8 = scmp.lt.s32.totalorder %s3506_s30, %s3500_s16 }
  0x2e   : > { %v3464_v19 = vld [vmem:[%s3706_s19 + $0xc0] sm:$0xff]   ;;  %v3433_v21 = vld [vmem:[%s3706_s19 + $0x88] sm:$0xff]   ;;  %v3434_v22 = vld [vmem:[%s3706_s19 + $0x90] sm:$0xff]  }
  0x2f   : > { %3126 = vmatprep.mubr.msk.bf16.mxu1 %vm700_vm0, %v3464_v19  ;;  %v3468_v23 = vld [vmem:[%s3706_s19 + $0xd0] sm:$0xff]   ;;  %v3470_v24 = vld [vmem:[%s3706_s19 + $0xd8] sm:$0xff]   ;;  %v3436_v26 = vld [vmem:[%s3706_s19 + $0xa0] sm:$0xff]   ;;  %p3502_p5 = pnand %p3501_p4, %p3681_p9  ;;  %p3509_p10 = por %p3508_p8, %p3507_p7 }
  0x30   : > { %3127 = vmatmul.mubr.msk.bf16.vlgmr.msra.gmra.mrb[0].mxu1 %vm700_vm0, %v3466_v20  ;;  %v3435_v25 = vld [vmem:[%s3706_s19 + $0x98] sm:$0xff]   ;;  %v3472_v27 = vld [vmem:[%s3706_s19 + $0xe0] sm:$0xff]   ;;  %v3474_v28 = vld [vmem:[%s3706_s19 + $0xe8] sm:$0xff]  }
  0x31   : > { %3130 = vmatprep.mubr.msk.bf16.mxu1 %vm700_vm0, %v3468_v23  ;;  %v3437_v29 = vld [vmem:[%s3706_s19 + $0xa8] sm:$0xff]   ;;  %v3438_v30 = vld [vmem:[%s3706_s19 + $0xb0] sm:$0xff]   ;;  %v3478_v32 = vld [vmem:[%s3706_s19 + $0xf8] sm:$0xff]   ;;  %3209 = vmatpush3.bf16.msra.mxu1 %v3480_v35  ;;  %p3503_p6 = pneg %p3502_p5 }
  0x32   : > { %3083 = vmatmul.mubr.msk.bf16.gmra.mrb[4].mxu0 %vm700_vm0, %v3418_v5  ;;  %v3476_v31 = vld [vmem:[%s3706_s19 + $0xf0] sm:$0xff]   ;;  %v3439_v33 = vld [vmem:[%s3706_s19 + $0xb8] sm:$0xff]   ;;  %v3440_v34 = vld [vmem:[%s3725_s24] sm:$0xff]   ;;  %3210 = vmatprep.subr.bf16.mxu1 %v3481_v36 }
  0x33   : > { %3086 = vmatprep.mubr.msk.bf16.mxu0 %vm700_vm0, %v3419_v6  ;;  %v3441_v37 = vld [vmem:[%s3725_s24 + $0x8] sm:$0xff]   ;;  %v3442_v39 = vld [vmem:[%s3725_s24 + $0x10] sm:$0xff]   ;;  %v3443_v41 = vld [vmem:[%s3725_s24 + $0x18] sm:$0xff]   ;;  %p3510_p11 = pnand %p3509_p10, %p3503_p6 }
  0x34   : > { %v3444_v43 = vld [vmem:[%s3725_s24 + $0x20] sm:$0xff]   ;;  %v3445_v45 = vld [vmem:[%s3725_s24 + $0x28] sm:$0xff]   ;;  %v3446_v46 = vld [vmem:[%s3725_s24 + $0x30] sm:$0xff]  }
  0x35   : > { %3211 = vmatpush3.bf16.msra.mxu1 %v3481_v36  ;;  %v3447_v47 = vld [vmem:[%s3725_s24 + $0x38] sm:$0xff]   ;;  %v3448_v48 = vld [vmem:[%s3725_s24 + $0x40] sm:$0xff]   ;;  %v3449_v49 = vld [vmem:[%s3725_s24 + $0x48] sm:$0xff]  }
  0x36   : > { %3212 = vmatprep.subr.bf16.mxu1 %v3482_v38  ;;  %v3450_v50 = vld [vmem:[%s3725_s24 + $0x50] sm:$0xff]   ;;  %v3451_v51 = vld [vmem:[%s3725_s24 + $0x58] sm:$0xff]   ;;  %v3452_v52 = vld [vmem:[%s3725_s24 + $0x60] sm:$0xff]  }
  0x37   : > { %v3453_v53 = vld [vmem:[%s3725_s24 + $0x68] sm:$0xff]   ;;  %v3454_v54 = vld [vmem:[%s3725_s24 + $0x70] sm:$0xff]   ;;  %v3455_v55 = vld [vmem:[%s3725_s24 + $0x78] sm:$0xff]  }
  0x38   : > { %3131 = vmatmul.mubr.msk.bf16.gmra.mrb[4].mxu1 %vm700_vm0, %v3470_v24  ;;  %v3456_v56 = vld [vmem:[%s3725_s24 + $0x80] sm:$0xff]   ;;  %v3457_v57 = vld [vmem:[%s3725_s24 + $0x88] sm:$0xff]   ;;  %v3458_v58 = vld [vmem:[%s3725_s24 + $0x90] sm:$0xff]  }
  0x39   : > { %3134 = vmatprep.mubr.msk.bf16.mxu1 %vm700_vm0, %v3472_v27  ;;  %3213 = vmatpush3.bf16.msra.mxu1 %v3482_v38  ;;  %v3459_v59 = vld [vmem:[%s3725_s24 + $0x98] sm:$0xff]   ;;  %v3460_v60 = vld [vmem:[%s3725_s24 + $0xa0] sm:$0xff]   ;;  %v3461_v61 = vld [vmem:[%s3725_s24 + $0xa8] sm:$0xff]  }
  0x3a   : > { %3087 = vmatmul.mubr.msk.bf16.gmra.mrb[8].mxu0 %vm700_vm0, %v3420_v7  ;;  %3214 = vmatprep.subr.bf16.mxu1 %v3483_v40  ;;  %v3462_v62 = vld [vmem:[%s3725_s24 + $0xb0] sm:$0xff]   ;;  %v3463_v63 = vld [vmem:[%s3725_s24 + $0xb8] sm:$0xff]   ;;  %v3465_v1 = vld [vmem:[%s3725_s24 + $0xc0] sm:$0xff]  }
  0x3b   : > { %3090 = vmatprep.mubr.msk.bf16.mxu0 %vm700_vm0, %v3421_v8  ;;  %v3487_v2 = vld [vmem:[%s4388_s7 + $0x38] sm:$0xff]   ;;  %v3467_v3 = vld [vmem:[%s3725_s24 + $0xc8] sm:$0xff]   ;;  %v3469_v4 = vld [vmem:[%s3725_s24 + $0xd0] sm:$0xff]  }
  0x3c   : > { %v3471_v5 = vld [vmem:[%s3725_s24 + $0xd8] sm:$0xff]   ;;  %v3473_v6 = vld [vmem:[%s3725_s24 + $0xe0] sm:$0xff]   ;;  %v3475_v7 = vld [vmem:[%s3725_s24 + $0xe8] sm:$0xff]  }
  0x3d   : > { %3215 = vmatpush3.bf16.msra.mxu1 %v3483_v40  ;;  %v3477_v8 = vld [vmem:[%s3725_s24 + $0xf0] sm:$0xff]  }
  0x3e   : > { %3216 = vmatprep.subr.bf16.mxu1 %v3484_v42 }
  0x40   : > { %3135 = vmatmul.mubr.msk.bf16.gmra.mrb[8].mxu1 %vm700_vm0, %v3474_v28 }
  0x41   : > { %3138 = vmatprep.mubr.msk.bf16.mxu1 %vm700_vm0, %v3476_v31  ;;  %3217 = vmatpush3.bf16.msra.mxu1 %v3484_v42 }
  0x42   : > { %3091 = vmatmul.mubr.msk.bf16.gmra.mrb[12].mxu0 %vm700_vm0, %v3422_v9  ;;  %3218 = vmatprep.subr.bf16.mxu1 %v3485_v44  ;;  %v3479_v9 = vld [vmem:[%s3725_s24 + $0xf8] sm:$0xff]   ;;  %s4306_s24 = scalar_lea.vmem %s4294_s10, %s3984_s13 [#allocation4] }
  0x43   : > { %3094 = vmatprep.mubr.msk.bf16.mxu0 %vm700_vm0, %v3423_v10 }
  0x45   : > { %3219 = vmatpush3.bf16.msra.mxu1 %v3485_v44 }
  0x46   : > { %3220 = vmatprep.subr.bf16.mxu1 %v3486_v0 }
  0x48   : > { %3139 = vmatmul.mubr.msk.bf16.gmra.mrb[12].mxu1 %vm700_vm0, %v3478_v32 }
  0x49   : > { %3221 = vmatpush3.bf16.msra.mxu1 %v3486_v0 }
  0x4a   : > { %3095 = vmatmul.mubr.msk.bf16.gmra.mrb[16].mxu0 %vm700_vm0, %v3424_v11  ;;  %3222 = vmatprep.subr.bf16.mxu1 %v3487_v2 }
  0x4b   : > { %3098 = vmatprep.mubr.msk.bf16.mxu0 %vm700_vm0, %v3425_v12 }
  0x4d   : > { %3223 = vmatpush3.bf16.msra.mxu1 %v3487_v2 }
  0x52   : > { %3099 = vmatmul.mubr.msk.bf16.gmra.mrb[20].mxu0 %vm700_vm0, %v3426_v13 }
  0x53   : > { %3102 = vmatprep.mubr.msk.bf16.mxu0 %vm700_vm0, %v3427_v14 }
  0x5a   : > { %3103 = vmatmul.mubr.msk.bf16.gmra.mrb[24].mxu0 %vm700_vm0, %v3428_v15 }
  0x5b   : > { %3106 = vmatprep.mubr.msk.bf16.mxu0 %vm700_vm0, %v3429_v16 }
  0x62   : > { %3107 = vmatmul.mubr.msk.bf16.gmra.mrb[28].mxu0 %vm700_vm0, %v3430_v17 }
  0x63   : > { %3110 = vmatprep.mubr.msk.bf16.mxu0 %vm700_vm0, %v3432_v18 }
  0x6a   : > { %3111 = vmatmul.mubr.msk.bf16.gmra.mrb[32].mxu0 %vm700_vm0, %v3433_v21 }
  0x6b   : > { %3114 = vmatprep.mubr.msk.bf16.mxu0 %vm700_vm0, %v3434_v22 }
  0x72   : > { %3115 = vmatmul.mubr.msk.bf16.gmra.mrb[36].mxu0 %vm700_vm0, %v3435_v25 }
  0x73   : > { %3118 = vmatprep.mubr.msk.bf16.mxu0 %vm700_vm0, %v3436_v26  ;;  %v3900_v26 = vld [vmem:[%s4387_s6] ss:$0 sm:$0xff] }
  0x7a   : > { %3119 = vmatmul.mubr.msk.bf16.gmra.mrb[40].mxu0 %vm700_vm0, %v3437_v29 }
  0x7b   : > { %3122 = vmatprep.mubr.msk.bf16.mxu0 %vm700_vm0, %v3438_v30 }
  0x82   : > { %3123 = vmatmul.mubr.msk.bf16.gmra.mrb[44].mxu0 %vm700_vm0, %v3439_v33 }
  0x83   : > { %3144 = vmatprep.mubr.msk.bf16.mxu0 %vm700_vm0, %v3440_v34 }
  0x8a   : > { %3145 = vmatmul.mubr.msk.bf16.vlgmr.msra.gmra.mrb[0].mxu0 %vm700_vm0, %v3441_v37 }
  0x8b   : > { %3148 = vmatprep.mubr.msk.bf16.mxu0 %vm700_vm0, %v3442_v39 }
  0x92   : > { %3149 = vmatmul.mubr.msk.bf16.gmra.mrb[4].mxu0 %vm700_vm0, %v3443_v41 }
  0x93   : > { %3152 = vmatprep.mubr.msk.bf16.mxu0 %vm700_vm0, %v3444_v43 }
  0x9a   : > { %3153 = vmatmul.mubr.msk.bf16.gmra.mrb[8].mxu0 %vm700_vm0, %v3445_v45 }
  0x9b   : > { %3156 = vmatprep.mubr.msk.bf16.mxu0 %vm700_vm0, %v3446_v46 }
  0xa2   : > { %3157 = vmatmul.mubr.msk.bf16.gmra.mrb[12].mxu0 %vm700_vm0, %v3447_v47 }
  0xa3   : > { %3160 = vmatprep.mubr.msk.bf16.mxu0 %vm700_vm0, %v3448_v48 }
  0xaa   : > { %3161 = vmatmul.mubr.msk.bf16.gmra.mrb[16].mxu0 %vm700_vm0, %v3449_v49 }
  0xab   : > { %3164 = vmatprep.mubr.msk.bf16.mxu0 %vm700_vm0, %v3450_v50 }
  0xb2   : > { %3165 = vmatmul.mubr.msk.bf16.gmra.mrb[20].mxu0 %vm700_vm0, %v3451_v51 }
  0xb3   : > { %3168 = vmatprep.mubr.msk.bf16.mxu0 %vm700_vm0, %v3452_v52 }
  0xba   : > { %3169 = vmatmul.mubr.msk.bf16.gmra.mrb[24].mxu0 %vm700_vm0, %v3453_v53 }
  0xbb   : > { %3172 = vmatprep.mubr.msk.bf16.mxu0 %vm700_vm0, %v3454_v54 }
  0xc2   : > { %3173 = vmatmul.mubr.msk.bf16.gmra.mrb[28].mxu0 %vm700_vm0, %v3455_v55 }
  0xc3   : > { %3176 = vmatprep.mubr.msk.bf16.mxu0 %vm700_vm0, %v3456_v56 }
  0xca   : > { %3177 = vmatmul.mubr.msk.bf16.gmra.mrb[32].mxu0 %vm700_vm0, %v3457_v57 }
  0xcb   : > { %3180 = vmatprep.mubr.msk.bf16.mxu0 %vm700_vm0, %v3458_v58 }
  0xd2   : > { %3181 = vmatmul.mubr.msk.bf16.gmra.mrb[36].mxu0 %vm700_vm0, %v3459_v59 }
  0xd3   : > { %3184 = vmatprep.mubr.msk.bf16.mxu0 %vm700_vm0, %v3460_v60 }
  0xda   : > { %3185 = vmatmul.mubr.msk.bf16.gmra.mrb[40].mxu0 %vm700_vm0, %v3461_v61 }
  0xdb   : > { %3188 = vmatprep.mubr.msk.bf16.mxu0 %vm700_vm0, %v3462_v62 }
  0xe2   : > { %3189 = vmatmul.mubr.msk.bf16.gmra.mrb[44].mxu0 %vm700_vm0, %v3463_v63 }
  0xe3   : > { %3192 = vmatprep.mubr.msk.bf16.mxu0 %vm700_vm0, %v3465_v1 }
  0xea   : > { %3193 = vmatmul.mubr.msk.bf16.gmra.mrb[48].mxu0 %vm700_vm0, %v3467_v3 }
  0xeb   : > { %3196 = vmatprep.mubr.msk.bf16.mxu0 %vm700_vm0, %v3469_v4 }
  0xf2   : > { %3197 = vmatmul.mubr.msk.bf16.gmra.mrb[52].mxu0 %vm700_vm0, %v3471_v5 }
  0xf3   : > { %3200 = vmatprep.mubr.msk.bf16.mxu0 %vm700_vm0, %v3473_v6 }
  0xfa   : > { %3201 = vmatmul.mubr.msk.bf16.gmra.mrb[56].mxu0 %vm700_vm0, %v3475_v7 }
  0xfb   : > { %3204 = vmatprep.mubr.msk.bf16.mxu0 %vm700_vm0, %v3477_v8 }
 0x102   : > { %3205 = vmatmul.mubr.msk.bf16.gmra.mrb[60].mxu0 %vm700_vm0, %v3479_v9 }
 0x103   : > { %v3865_v10 = vpop.f32.mrb[0].mxu1 }
 0x104   : > { %v3867_v11 = vpop.f32.mrb[1].mxu1 }
 0x105   : > { %v3869_v12 = vpop.f32.mrb[2].mxu1 }
 0x106   : > { %v3871_v13 = vpop.f32.mrb[3].mxu1 }
 0x10b   : > { %v3873_v14 = vpop.f32.mrb[4].mxu1 }
 0x10c   : > { %v3875_v15 = vpop.f32.mrb[5].mxu1 }
 0x10d   : > { %v3877_v16 = vpop.f32.mrb[6].mxu1 }
 0x10e   : > { %v3879_v17 = vpop.f32.mrb[7].mxu1 }
 0x113   : > { %v3881_v18 = vpop.f32.mrb[8].mxu1 }
 0x114   : > { %v3883_v19 = vpop.f32.mrb[9].mxu1 }
 0x115   : > { %v3885_v20 = vpop.f32.mrb[10].mxu1 }
 0x116   : > { %v3887_v21 = vpop.f32.mrb[11].mxu1 }
 0x11b   : > { %v3889_v22 = vpop.f32.mrb[12].mxu1 }
 0x11c   : > { %v3891_v23 = vpop.f32.mrb[13].mxu1 }
 0x11d   : > { %v3893_v24 = vpop.f32.mrb[14].mxu1 }
 0x11e   : > { %v3895_v25 = vpop.f32.mrb[15].mxu1 }
 0x15d   : > { %v3146_v27 = vpop.f32.mrb[0].mxu0 }
 0x15e   : > { %v1646_v28 = vadd.f32 %v3146_v27, %v3900_v26  ;;  %v1382_v29 = vpop.f32.mrb[1].mxu0 }
 0x15f   : > { %v1644_v30 = vadd.f32 %v3900_v26, %v1382_v29  ;;  %v3147_v31 = vpop.f32.mrb[2].mxu0 }
 0x160   : > { %v1647_v32 = vadd.f32 %v3147_v31, %v3900_v26  ;;  %v1385_v33 = vpop.f32.mrb[3].mxu0  ;;  %v1710_v35 = vmax.f32 %v1646_v28, 0.0 }
 0x161   : > { %v1645_v34 = vadd.f32 %v3900_v26, %v1385_v33  ;;  %v1708_v37 = vmax.f32 %v1644_v30, 0.0 }
 0x162   : > { %v1711_v36 = vmax.f32 %v1647_v32, 0.0 }
 0x163   : > { %v1709_v38 = vmax.f32 %v1645_v34, 0.0 }
 0x164   : > { %v1773_v39 = vpack.c.bf16 %v1711_v36, %v1710_v35 }
 0x165   : > { %v1772_v40 = vpack.c.bf16 %v1709_v38, %v1708_v37  ;;  %v3150_v41 = vpop.f32.mrb[4].mxu0 }
 0x166   : > { %v1650_v42 = vadd.f32 %v3150_v41, %v3900_v26  ;;  %v1398_v43 = vpop.f32.mrb[5].mxu0 }
 0x167   : > { %v1648_v44 = vadd.f32 %v3900_v26, %v1398_v43  ;;  %v3151_v45 = vpop.f32.mrb[6].mxu0  ;;  %3224 = vmatprep.mubr.bf16.mxu1 %v1772_v40 }
 0x168   : > { %v1651_v46 = vadd.f32 %v3151_v45, %v3900_v26  ;;  %v1401_v47 = vpop.f32.mrb[7].mxu0  ;;  %3225 = vmatmul.mubr.bf16.vlgmr.msra.gmra.mrb[16].mxu1 %v1773_v39  ;;  %v1714_v49 = vmax.f32 %v1650_v42, 0.0 }
 0x169   : > { %v1649_v48 = vadd.f32 %v3900_v26, %v1401_v47  ;;  %v1712_v51 = vmax.f32 %v1648_v44, 0.0 }
 0x16a   : > { %v1715_v50 = vmax.f32 %v1651_v46, 0.0 }
 0x16b   : > { %v1713_v52 = vmax.f32 %v1649_v48, 0.0 }
 0x16c   : > { %v1775_v53 = vpack.c.bf16 %v1715_v50, %v1714_v49 }
 0x16d   : > { %v1774_v54 = vpack.c.bf16 %v1713_v52, %v1712_v51  ;;  %v3154_v55 = vpop.f32.mrb[8].mxu0 }
 0x16e   : > { %v1654_v56 = vadd.f32 %v3154_v55, %v3900_v26  ;;  %v1414_v57 = vpop.f32.mrb[9].mxu0 }
 0x16f   : > { %v1652_v58 = vadd.f32 %v3900_v26, %v1414_v57  ;;  %v3155_v59 = vpop.f32.mrb[10].mxu0  ;;  %3228 = vmatprep.mubr.bf16.mxu1 %v1774_v54 }
 0x170   : > { %v1655_v60 = vadd.f32 %v3155_v59, %v3900_v26  ;;  %v1417_v61 = vpop.f32.mrb[11].mxu0  ;;  %3229 = vmatmul.mubr.bf16.gmra.mrb[20].mxu1 %v1775_v53  ;;  %v1718_v63 = vmax.f32 %v1654_v56, 0.0 }
 0x171   : > { %v1653_v62 = vadd.f32 %v3900_v26, %v1417_v61  ;;  %v1716_v1 = vmax.f32 %v1652_v58, 0.0 }
 0x172   : > { %v1719_v0 = vmax.f32 %v1655_v60, 0.0 }
 0x173   : > { %v1717_v2 = vmax.f32 %v1653_v62, 0.0 }
 0x174   : > { %v1777_v3 = vpack.c.bf16 %v1719_v0, %v1718_v63 }
 0x175   : > { %v1776_v4 = vpack.c.bf16 %v1717_v2, %v1716_v1  ;;  %v3158_v5 = vpop.f32.mrb[12].mxu0 }
 0x176   : > { %v1658_v6 = vadd.f32 %v3158_v5, %v3900_v26  ;;  %v1430_v7 = vpop.f32.mrb[13].mxu0 }
 0x177   : > { %v1656_v8 = vadd.f32 %v3900_v26, %v1430_v7  ;;  %v3159_v9 = vpop.f32.mrb[14].mxu0  ;;  %3232 = vmatprep.mubr.bf16.mxu1 %v1776_v4 }
 0x178   : > { %v1659_v27 = vadd.f32 %v3159_v9, %v3900_v26  ;;  %v1433_v28 = vpop.f32.mrb[15].mxu0  ;;  %3233 = vmatmul.mubr.bf16.gmra.mrb[24].mxu1 %v1777_v3  ;;  %v1722_v30 = vmax.f32 %v1658_v6, 0.0 }
 0x179   : > { %v1657_v29 = vadd.f32 %v3900_v26, %v1433_v28  ;;  %v1720_v32 = vmax.f32 %v1656_v8, 0.0 }
 0x17a   : > { %v1723_v31 = vmax.f32 %v1659_v27, 0.0 }
 0x17b   : > { %v1721_v33 = vmax.f32 %v1657_v29, 0.0 }
 0x17c   : > { %v1779_v34 = vpack.c.bf16 %v1723_v31, %v1722_v30 }
 0x17d   : > { %v1778_v35 = vpack.c.bf16 %v1721_v33, %v1720_v32  ;;  %v3162_v36 = vpop.f32.mrb[16].mxu0 }
 0x17e   : > { %v1662_v37 = vadd.f32 %v3162_v36, %v3900_v26  ;;  %v1446_v38 = vpop.f32.mrb[17].mxu0 }
 0x17f   : > { %v1660_v39 = vadd.f32 %v3900_v26, %v1446_v38  ;;  %v3163_v40 = vpop.f32.mrb[18].mxu0  ;;  %3236 = vmatprep.mubr.bf16.mxu1 %v1778_v35 }
 0x180   : > { %v1663_v41 = vadd.f32 %v3163_v40, %v3900_v26  ;;  %v1449_v42 = vpop.f32.mrb[19].mxu0  ;;  %3237 = vmatmul.mubr.bf16.gmra.mrb[28].mxu1 %v1779_v34  ;;  %v1726_v44 = vmax.f32 %v1662_v37, 0.0 }
 0x181   : > { %v1661_v43 = vadd.f32 %v3900_v26, %v1449_v42  ;;  %v1724_v46 = vmax.f32 %v1660_v39, 0.0 }
 0x182   : > { %v1727_v45 = vmax.f32 %v1663_v41, 0.0 }
 0x183   : > { %v1725_v47 = vmax.f32 %v1661_v43, 0.0 }
 0x184   : > { %v1781_v48 = vpack.c.bf16 %v1727_v45, %v1726_v44 }
 0x185   : > { %v1780_v49 = vpack.c.bf16 %v1725_v47, %v1724_v46  ;;  %v3166_v50 = vpop.f32.mrb[20].mxu0 }
 0x186   : > { %v1666_v51 = vadd.f32 %v3166_v50, %v3900_v26  ;;  %v1462_v52 = vpop.f32.mrb[21].mxu0 }
 0x187   : > { %v1664_v53 = vadd.f32 %v3900_v26, %v1462_v52  ;;  %v3167_v54 = vpop.f32.mrb[22].mxu0  ;;  %3240 = vmatprep.mubr.bf16.mxu1 %v1780_v49 }
 0x188   : > { %v1667_v55 = vadd.f32 %v3167_v54, %v3900_v26  ;;  %v1465_v56 = vpop.f32.mrb[23].mxu0  ;;  %3241 = vmatmul.mubr.bf16.gmra.mrb[32].mxu1 %v1781_v48  ;;  %v1730_v58 = vmax.f32 %v1666_v51, 0.0 }
 0x189   : > { %v1665_v57 = vadd.f32 %v3900_v26, %v1465_v56  ;;  %v1728_v60 = vmax.f32 %v1664_v53, 0.0 }
 0x18a   : > { %v1731_v59 = vmax.f32 %v1667_v55, 0.0 }
 0x18b   : > { %v1729_v61 = vmax.f32 %v1665_v57, 0.0 }
 0x18c   : > { %v1783_v62 = vpack.c.bf16 %v1731_v59, %v1730_v58 }
 0x18d   : > { %v1782_v63 = vpack.c.bf16 %v1729_v61, %v1728_v60  ;;  %v3170_v0 = vpop.f32.mrb[24].mxu0 }
 0x18e   : > { %v1670_v1 = vadd.f32 %v3170_v0, %v3900_v26  ;;  %v1478_v2 = vpop.f32.mrb[25].mxu0 }
 0x18f   : > { %v1668_v3 = vadd.f32 %v3900_v26, %v1478_v2  ;;  %v3171_v4 = vpop.f32.mrb[26].mxu0  ;;  %3244 = vmatprep.mubr.bf16.mxu1 %v1782_v63 }
 0x190   : > { %v1671_v5 = vadd.f32 %v3171_v4, %v3900_v26  ;;  %v1481_v6 = vpop.f32.mrb[27].mxu0  ;;  %3245 = vmatmul.mubr.bf16.gmra.mrb[36].mxu1 %v1783_v62  ;;  %v1734_v8 = vmax.f32 %v1670_v1, 0.0 }
 0x191   : > { %v1669_v7 = vadd.f32 %v3900_v26, %v1481_v6  ;;  %v1732_v27 = vmax.f32 %v1668_v3, 0.0 }
 0x192   : > { %v1735_v9 = vmax.f32 %v1671_v5, 0.0 }
 0x193   : > { %v1733_v28 = vmax.f32 %v1669_v7, 0.0 }
 0x194   : > { %v1785_v29 = vpack.c.bf16 %v1735_v9, %v1734_v8 }
 0x195   : > { %v1784_v30 = vpack.c.bf16 %v1733_v28, %v1732_v27  ;;  %v3174_v31 = vpop.f32.mrb[28].mxu0 }
 0x196   : > { %v1674_v32 = vadd.f32 %v3174_v31, %v3900_v26  ;;  %v1494_v33 = vpop.f32.mrb[29].mxu0 }
 0x197   : > { %v1672_v34 = vadd.f32 %v3900_v26, %v1494_v33  ;;  %v3175_v35 = vpop.f32.mrb[30].mxu0  ;;  %3248 = vmatprep.mubr.bf16.mxu1 %v1784_v30 }
 0x198   : > { %v1675_v36 = vadd.f32 %v3175_v35, %v3900_v26  ;;  %v1497_v37 = vpop.f32.mrb[31].mxu0  ;;  %3249 = vmatmul.mubr.bf16.gmra.mrb[40].mxu1 %v1785_v29  ;;  %v1738_v39 = vmax.f32 %v1674_v32, 0.0 }
 0x199   : > { %v1673_v38 = vadd.f32 %v3900_v26, %v1497_v37  ;;  %v1736_v41 = vmax.f32 %v1672_v34, 0.0 }
 0x19a   : > { %v1739_v40 = vmax.f32 %v1675_v36, 0.0 }
 0x19b   : > { %v1737_v42 = vmax.f32 %v1673_v38, 0.0 }
 0x19c   : > { %v1787_v43 = vpack.c.bf16 %v1739_v40, %v1738_v39 }
 0x19d   : > { %v1786_v44 = vpack.c.bf16 %v1737_v42, %v1736_v41  ;;  %v3178_v45 = vpop.f32.mrb[32].mxu0 }
 0x19e   : > { %v1678_v46 = vadd.f32 %v3178_v45, %v3900_v26  ;;  %v1510_v47 = vpop.f32.mrb[33].mxu0 }
 0x19f   : > { %v1676_v48 = vadd.f32 %v3900_v26, %v1510_v47  ;;  %v3179_v49 = vpop.f32.mrb[34].mxu0  ;;  %3252 = vmatprep.mubr.bf16.mxu1 %v1786_v44 }
 0x1a0   : > { %v1679_v50 = vadd.f32 %v3179_v49, %v3900_v26  ;;  %v1513_v51 = vpop.f32.mrb[35].mxu0  ;;  %3253 = vmatmul.mubr.bf16.gmra.mrb[44].mxu1 %v1787_v43  ;;  %v1742_v53 = vmax.f32 %v1678_v46, 0.0 }
 0x1a1   : > { %v1677_v52 = vadd.f32 %v3900_v26, %v1513_v51  ;;  %v1740_v55 = vmax.f32 %v1676_v48, 0.0 }
 0x1a2   : > { %v1743_v54 = vmax.f32 %v1679_v50, 0.0 }
 0x1a3   : > { %v1741_v56 = vmax.f32 %v1677_v52, 0.0 }
 0x1a4   : > { %v1789_v57 = vpack.c.bf16 %v1743_v54, %v1742_v53 }
 0x1a5   : > { %v1788_v58 = vpack.c.bf16 %v1741_v56, %v1740_v55  ;;  %v3182_v59 = vpop.f32.mrb[36].mxu0 }
 0x1a6   : > { %v1682_v60 = vadd.f32 %v3182_v59, %v3900_v26  ;;  %v1526_v61 = vpop.f32.mrb[37].mxu0 }
 0x1a7   : > { %v1680_v62 = vadd.f32 %v3900_v26, %v1526_v61  ;;  %v3183_v63 = vpop.f32.mrb[38].mxu0  ;;  %3256 = vmatprep.mubr.bf16.mxu1 %v1788_v58 }
 0x1a8   : > { %v1683_v0 = vadd.f32 %v3183_v63, %v3900_v26  ;;  %v1529_v1 = vpop.f32.mrb[39].mxu0  ;;  %3257 = vmatmul.mubr.bf16.gmra.mrb[48].mxu1 %v1789_v57  ;;  %v1746_v3 = vmax.f32 %v1682_v60, 0.0 }
 0x1a9   : > { %v1681_v2 = vadd.f32 %v3900_v26, %v1529_v1  ;;  %v1744_v5 = vmax.f32 %v1680_v62, 0.0 }
 0x1aa   : > { %v1747_v4 = vmax.f32 %v1683_v0, 0.0 }
 0x1ab   : > { %v1745_v6 = vmax.f32 %v1681_v2, 0.0 }
 0x1ac   : > { %v1791_v7 = vpack.c.bf16 %v1747_v4, %v1746_v3 }
 0x1ad   : > { %v1790_v8 = vpack.c.bf16 %v1745_v6, %v1744_v5  ;;  %v3186_v9 = vpop.f32.mrb[40].mxu0 }
 0x1ae   : > { %v1686_v27 = vadd.f32 %v3186_v9, %v3900_v26  ;;  %v1542_v28 = vpop.f32.mrb[41].mxu0 }
 0x1af   : > { %v1684_v29 = vadd.f32 %v3900_v26, %v1542_v28  ;;  %v3187_v30 = vpop.f32.mrb[42].mxu0  ;;  %3260 = vmatprep.mubr.bf16.mxu1 %v1790_v8 }
 0x1b0   : > { %v1687_v31 = vadd.f32 %v3187_v30, %v3900_v26  ;;  %v1545_v32 = vpop.f32.mrb[43].mxu0  ;;  %3261 = vmatmul.mubr.bf16.gmra.mrb[52].mxu1 %v1791_v7  ;;  %v1750_v34 = vmax.f32 %v1686_v27, 0.0 }
 0x1b1   : > { %v1685_v33 = vadd.f32 %v3900_v26, %v1545_v32  ;;  %v1748_v36 = vmax.f32 %v1684_v29, 0.0 }
 0x1b2   : > { %v1751_v35 = vmax.f32 %v1687_v31, 0.0 }
 0x1b3   : > { %v1749_v37 = vmax.f32 %v1685_v33, 0.0 }
 0x1b4   : > { %v1793_v38 = vpack.c.bf16 %v1751_v35, %v1750_v34 }
 0x1b5   : > { %v1792_v39 = vpack.c.bf16 %v1749_v37, %v1748_v36  ;;  %v3190_v40 = vpop.f32.mrb[44].mxu0 }
 0x1b6   : > { %v1690_v41 = vadd.f32 %v3190_v40, %v3900_v26  ;;  %v1558_v42 = vpop.f32.mrb[45].mxu0 }
 0x1b7   : > { %v1688_v43 = vadd.f32 %v3900_v26, %v1558_v42  ;;  %v3191_v44 = vpop.f32.mrb[46].mxu0  ;;  %3264 = vmatprep.mubr.bf16.mxu1 %v1792_v39 }
 0x1b8   : > { %v1691_v45 = vadd.f32 %v3191_v44, %v3900_v26  ;;  %v1561_v46 = vpop.f32.mrb[47].mxu0  ;;  %3265 = vmatmul.mubr.bf16.gmra.mrb[56].mxu1 %v1793_v38  ;;  %v1754_v48 = vmax.f32 %v1690_v41, 0.0 }
 0x1b9   : > { %v1689_v47 = vadd.f32 %v3900_v26, %v1561_v46  ;;  %v1752_v50 = vmax.f32 %v1688_v43, 0.0 }
 0x1ba   : > { %v1755_v49 = vmax.f32 %v1691_v45, 0.0 }
 0x1bb   : > { %v1753_v51 = vmax.f32 %v1689_v47, 0.0 }
 0x1bc   : > { %v1795_v52 = vpack.c.bf16 %v1755_v49, %v1754_v48 }
 0x1bd   : > { %v1794_v53 = vpack.c.bf16 %v1753_v51, %v1752_v50  ;;  %v3194_v54 = vpop.f32.mrb[48].mxu0 }
 0x1be   : > { %v1583_v55 = vadd.f32 %v3194_v54, %v3865_v10  ;;  %v1574_v56 = vpop.f32.mrb[49].mxu0 }
 0x1bf   : > { %v1575_v57 = vadd.f32 %v1574_v56, %v3867_v11  ;;  %v3195_v58 = vpop.f32.mrb[50].mxu0  ;;  %3268 = vmatprep.mubr.bf16.mxu1 %v1794_v53 }
 0x1c0   : > { %v1694_v59 = vadd.f32 %v3900_v26, %v1583_v55  ;;  %v1586_v60 = vadd.f32 %v3195_v58, %v3869_v12  ;;  %v1577_v61 = vpop.f32.mrb[51].mxu0  ;;  %3269 = vmatmul.mubr.bf16.gmra.mrb[60].mxu1 %v1795_v52 }
 0x1c1   : > { %v1692_v62 = vadd.f32 %v3900_v26, %v1575_v57  ;;  %v1578_v63 = vadd.f32 %v1577_v61, %v3871_v13 }
 0x1c2   : > { %v1695_v0 = vadd.f32 %v3900_v26, %v1586_v60  ;;  %v1758_v10 = vmax.f32 %v1694_v59, 0.0 }
 0x1c3   : > { %v1693_v1 = vadd.f32 %v3900_v26, %v1578_v63  ;;  %v1756_v3 = vmax.f32 %v1692_v62, 0.0 }
 0x1c4   : > { %v1759_v2 = vmax.f32 %v1695_v0, 0.0 }
 0x1c5   : > { %v1757_v11 = vmax.f32 %v1693_v1, 0.0  ;;  %v3198_v4 = vpop.f32.mrb[52].mxu0 }
 0x1c6   : > { %v1599_v5 = vadd.f32 %v3198_v4, %v3873_v14  ;;  %v1590_v6 = vpop.f32.mrb[53].mxu0  ;;  %v1797_v7 = vpack.c.bf16 %v1759_v2, %v1758_v10  ;;  %v3993_v10 = vld [vmem:[%s384_s22] sm:$0xf]  ;;  %v2239_v2 = vstv %s3984_s13  ;;  %s4335_s22 = scalar_lea.sflag [#allocation5], %s361_s29 }
 0x1c7   : > { %v1591_v12 = vadd.f32 %v1590_v6, %v3875_v15  ;;  %v3199_v8 = vpop.f32.mrb[54].mxu0  ;;  %v1796_v9 = vpack.c.bf16 %v1757_v11, %v1756_v3 }
 0x1c8   : > { %v1698_v27 = vadd.f32 %v3900_v26, %v1599_v5  ;;  %v1602_v13 = vadd.f32 %v3199_v8, %v3877_v16  ;;  %v1593_v28 = vpop.f32.mrb[55].mxu0 }
 0x1c9   : > { %v1696_v29 = vadd.f32 %v3900_v26, %v1591_v12  ;;  %v1594_v30 = vadd.f32 %v1593_v28, %v3879_v17  ;;  %3272 = vmatprep.mubr.bf16.mxu1 %v1796_v9 }
 0x1ca   : > { %v1699_v31 = vadd.f32 %v3900_v26, %v1602_v13  ;;  %3273 = vmatmul.mubr.bf16.gmra.mrb[64].mxu1 %v1797_v7  ;;  %v1762_v32 = vmax.f32 %v1698_v27, 0.0  ;;  %v3583_v7 = vmov 1.0|1.0  }
 0x1cb   : > { %v1697_v14 = vadd.f32 %v3900_v26, %v1594_v30  ;;  %v1760_v15 = vmax.f32 %v1696_v29, 0.0 }
 0x1cc   : > { %v1763_v33 = vmax.f32 %v1699_v31, 0.0 }
 0x1cd   : > { %v1761_v34 = vmax.f32 %v1697_v14, 0.0  ;;  %v3202_v35 = vpop.f32.mrb[56].mxu0 }
 0x1ce   : > { %v1615_v36 = vadd.f32 %v3202_v35, %v3881_v18  ;;  %v1606_v37 = vpop.f32.mrb[57].mxu0  ;;  %v1799_v16 = vpack.c.bf16 %v1763_v33, %v1762_v32 }
 0x1cf   : > { %v1607_v38 = vadd.f32 %v1606_v37, %v3883_v19  ;;  %v3203_v39 = vpop.f32.mrb[58].mxu0  ;;  %v1798_v40 = vpack.c.bf16 %v1761_v34, %v1760_v15 }
 0x1d0   : > { %v1702_v17 = vadd.f32 %v3900_v26, %v1615_v36  ;;  %v1618_v41 = vadd.f32 %v3203_v39, %v3885_v20  ;;  %v1609_v42 = vpop.f32.mrb[59].mxu0 }
 0x1d1   : > { %v1700_v43 = vadd.f32 %v3900_v26, %v1607_v38  ;;  %v1610_v44 = vadd.f32 %v1609_v42, %v3887_v21  ;;  %3276 = vmatprep.mubr.bf16.mxu1 %v1798_v40 }
 0x1d2   : > { %v1703_v45 = vadd.f32 %v3900_v26, %v1618_v41  ;;  %3277 = vmatmul.mubr.bf16.gmra.mrb[68].mxu1 %v1799_v16  ;;  %v1766_v46 = vmax.f32 %v1702_v17, 0.0  ;;  %v4058_v16 = vld [vmem:[%s4389_s8] ss:$0 sm:$0xff] }
 0x1d3   : > { %v1701_v18 = vadd.f32 %v3900_v26, %v1610_v44  ;;  %v1764_v19 = vmax.f32 %v1700_v43, 0.0 }
 0x1d4   : > { %v1767_v47 = vmax.f32 %v1703_v45, 0.0 }
 0x1d5   : > { %v1765_v48 = vmax.f32 %v1701_v18, 0.0  ;;  %v3206_v49 = vpop.f32.mrb[60].mxu0 }
 0x1d6   : > { %v1631_v50 = vadd.f32 %v3206_v49, %v3889_v22  ;;  %v1622_v51 = vpop.f32.mrb[61].mxu0  ;;  %v1801_v20 = vpack.c.bf16 %v1767_v47, %v1766_v46 }
 0x1d7   : > { %v1623_v52 = vadd.f32 %v1622_v51, %v3891_v23  ;;  %v3207_v53 = vpop.f32.mrb[62].mxu0  ;;  %v1800_v54 = vpack.c.bf16 %v1765_v48, %v1764_v19 }
 0x1d8   : > { %v1706_v21 = vadd.f32 %v3900_v26, %v1631_v50  ;;  %v1634_v55 = vadd.f32 %v3207_v53, %v3893_v24  ;;  %v1625_v56 = vpop.f32.mrb[63].mxu0  ;;  %v2230_v24 = vlaneseq }
 0x1d9   : > { %v1704_v57 = vadd.f32 %v3900_v26, %v1623_v52  ;;  %v1626_v58 = vadd.f32 %v1625_v56, %v3895_v25  ;;  %3280 = vmatprep.mubr.bf16.mxu1 %v1800_v54 }
 0x1da   : > { %v1707_v22 = vadd.f32 %v3900_v26, %v1634_v55  ;;  %3281 = vmatmul.mubr.bf16.gmra.mrb[72].mxu1 %v1801_v20  ;;  %v1770_v23 = vmax.f32 %v1706_v21, 0.0  ;;  %v3986_v25 = vshrl.u32 %v2230_v24, 7 }
 0x1db   : > { %v1705_v59 = vadd.f32 %v3900_v26, %v1626_v58  ;;  %v1768_v61 = vmax.f32 %v1704_v57, 0.0 }
 0x1dc   : > { %v1771_v60 = vmax.f32 %v1707_v22, 0.0  ;;  %v2232_v26 = vadd.s32 8, %v3986_v25  ;;  %v2254_v1 = vsub.s32 1, %v3986_v25  ;;  %v2250_v3 = vsub.s32 0, %v3986_v25 }
 0x1dd   : > { %v1769_v62 = vmax.f32 %v1705_v59, 0.0  ;;  %v3998_v11 = vadd.s32 %v2239_v2, %v3986_v25  ;;  %v2233_v8 = vadd.s32 16, %v3986_v25  ;;  %v2234_v9 = vadd.s32 24, %v3986_v25 }
 0x1de   : > { %v1803_v63 = vpack.c.bf16 %v1771_v60, %v1770_v23  ;;  %v4000_v4 = vadd.s32 %v2239_v2, %v2232_v26  ;;  %v2255_v5 = vrot.slane %v3993_v10, %v2254_v1  ;;  %v2251_v6 = vrot.slane %v3993_v10, %v2250_v3 }
 0x1df   : > { %v1802_v0 = vpack.c.bf16 %v1769_v62, %v1768_v61  ;;  %v4015_v27 = vadd.s32 %v2239_v2, %v2233_v8  ;;  %v4017_v13 = vadd.s32 %v2239_v2, %v2234_v9  ;;  %v2235_v30 = vadd.s32 32, %v3986_v25 }
 0x1e0   : > { %vm2265_vm1 = vcmp.eq.s32.totalorder %v3998_v11, %v2255_v5  ;;  %vm2269_vm2 = vcmp.eq.s32.totalorder %v4000_v4, %v2255_v5  ;;  %vm2264_vm4 = vcmp.eq.s32.totalorder %v3998_v11, %v2251_v6  ;;  %vm2268_vm5 = vcmp.eq.s32.totalorder %v4000_v4, %v2251_v6 }
 0x1e1   : > { %3284 = vmatprep.mubr.bf16.mxu1 %v1802_v0  ;;  %vm2852_vm3 = vmpackc.low %vm2269_vm2, %vm2265_vm1  ;;  %vm2273_vm7 = vcmp.eq.s32.totalorder %v4015_v27, %v2255_v5  ;;  %vm2277_vm8 = vcmp.eq.s32.totalorder %v4017_v13, %v2255_v5  ;;  %vm2272_vm10 = vcmp.eq.s32.totalorder %v4015_v27, %v2251_v6  ;;  %vm2276_vm11 = vcmp.eq.s32.totalorder %v4017_v13, %v2251_v6 }
 0x1e2   : > { %3285 = vmatmul.mubr.bf16.gmra.mrb[76].mxu1 %v1803_v63  ;;  %vm4009_vm6 = vmpackc.low %vm2268_vm5, %vm2264_vm4  ;;  %v2236_v31 = vadd.s32 40, %v3986_v25  ;;  %v4033_v14 = vadd.s32 %v2239_v2, %v2235_v30  ;;  %v2237_v34 = vadd.s32 48, %v3986_v25  ;;  %v2238_v35 = vadd.s32 56, %v3986_v25 }
 0x1e3   : > { %2853 = vmatprep.mubr.msk.bf16.mxu1 %vm2852_vm3, %v3583_v7  ;;  %vm4021_vm9 = vmpackc.low %vm2277_vm8, %vm2273_vm7  ;;  %v2262_v19 = vsub.s32 3, %v3986_v25  ;;  %v2258_v50 = vsub.s32 2, %v3986_v25  ;;  %v4413_v25 = vmov 0 }
 0x1e4   : > { %vm4027_vm12 = vmpackc.low %vm2276_vm11, %vm2272_vm10  ;;  %v4035_v32 = vadd.s32 %v2239_v2, %v2236_v31  ;;  %vm2281_vm13 = vcmp.eq.s32.totalorder %v4033_v14, %v2255_v5  ;;  %vm2280_vm0 = vcmp.eq.s32.totalorder %v4033_v14, %v2251_v6  ;;  %v4051_v36 = vadd.s32 %v2239_v2, %v2237_v34 }
 0x1e5   : > { %v4053_v37 = vadd.s32 %v2239_v2, %v2238_v35  ;;  %v2263_v20 = vrot.slane %v3993_v10, %v2262_v19  ;;  %v4084_v54 = vrot.slane %v3993_v10, %v2258_v50  ;;  %v4417_v34 = vmov 0 }
 0x1e6   : > { %vm2285_vm14 = vcmp.eq.s32.totalorder %v4035_v32, %v2255_v5  ;;  %vm2284_vm1 = vcmp.eq.s32.totalorder %v4035_v32, %v2251_v6  ;;  %vm2289_vm3 = vcmp.eq.s32.totalorder %v4051_v36, %v2255_v5  ;;  %vm2288_vm7 = vcmp.eq.s32.totalorder %v4051_v36, %v2251_v6 }
 0x1e7   : > { %vm4039_vm15 = vmpackc.low %vm2285_vm14, %vm2281_vm13  ;;  %vm2293_vm4 = vcmp.eq.s32.totalorder %v4053_v37, %v2255_v5  ;;  %vm2292_vm8 = vcmp.eq.s32.totalorder %v4053_v37, %v2251_v6  ;;  %vm2267_vm11 = vcmp.eq.s32.totalorder %v3998_v11, %v2263_v20  ;;  %vm2271_vm13 = vcmp.eq.s32.totalorder %v4000_v4, %v2263_v20 }
 0x1e8   : > { %vm4045_vm2 = vmpackc.low %vm2284_vm1, %vm2280_vm0  ;;  %vm2266_vm0 = vcmp.eq.s32.totalorder %v3998_v11, %v4084_v54  ;;  %vm2270_vm1 = vcmp.eq.s32.totalorder %v4000_v4, %v4084_v54 }
 0x1e9   : > { %vm4062_vm5 = vmpackc.low %vm2293_vm4, %vm2289_vm3  ;;  %vm2275_vm4 = vcmp.eq.s32.totalorder %v4015_v27, %v2263_v20 }
 0x1ea   : > { %vm4068_vm10 = vmpackc.low %vm2292_vm8, %vm2288_vm7  ;;  %vm2279_vm7 = vcmp.eq.s32.totalorder %v4017_v13, %v2263_v20 }
 0x1eb   : > { %vm4090_vm14 = vmpackc.low %vm2271_vm13, %vm2267_vm11  ;;  %vm2274_vm11 = vcmp.eq.s32.totalorder %v4015_v27, %v4084_v54  ;;  %vm2278_vm13 = vcmp.eq.s32.totalorder %v4017_v13, %v4084_v54  ;;  %v4415_v13 = vmov 0 }
 0x1ec   : > { %vm4099_vm3 = vmpackc.low %vm2270_vm1, %vm2266_vm0  ;;  %vm2283_vm1 = vcmp.eq.s32.totalorder %v4033_v14, %v2263_v20 }
 0x1ed   : > { %vm4106_vm8 = vmpackc.low %vm2279_vm7, %vm2275_vm4  ;;  %vm2287_vm4 = vcmp.eq.s32.totalorder %v4035_v32, %v2263_v20 }
 0x1ee   : > { %vm4114_vm0 = vmpackc.low %vm2278_vm13, %vm2274_vm11  ;;  %vm2282_vm11 = vcmp.eq.s32.totalorder %v4033_v14, %v4084_v54  ;;  %vm2286_vm13 = vcmp.eq.s32.totalorder %v4035_v32, %v4084_v54 }
 0x1ef   : > { %v4414_v25 = vsel %vm4114_vm0, 4294967295, %v4413_v25  ;;  %vm4128_vm7 = vmpackc.low %vm2287_vm4, %vm2283_vm1  ;;  %vm2291_vm1 = vcmp.eq.s32.totalorder %v4051_v36, %v2263_v20  ;;  %vm2295_vm4 = vcmp.eq.s32.totalorder %v4053_v37, %v2263_v20 }
 0x1f0   : > { %v4416_v13 = vsel %vm4128_vm7, 4294967295, %v4415_v13  ;;  %vm4136_vm0 = vmpackc.low %vm2286_vm13, %vm2282_vm11  ;;  %vm2290_vm13 = vcmp.eq.s32.totalorder %v4051_v36, %v4084_v54 }
 0x1f1   : > { %v4418_v34 = vsel %vm4136_vm0, 4294967295, %v4417_v34  ;;  %vm4150_vm11 = vmpackc.low %vm2295_vm4, %vm2291_vm1  ;;  %vm2294_vm0 = vcmp.eq.s32.totalorder %v4053_v37, %v4084_v54 }
 0x1f2   : > { %vm4158_vm7 = vmpackc.low %vm2294_vm0, %vm2290_vm13 }
 0x23b   : > { %v3226_v39 = vpop.f32.mrb[16].mxu1 }
 0x23c   : > { %v1918_v17 = vadd.f32 %v3226_v39, %v4058_v16  ;;  %v1909_v41 = vpop.f32.mrb[17].mxu1 }
 0x23d   : > { %v1910_v42 = vadd.f32 %v4058_v16, %v1909_v41  ;;  %v3227_v43 = vpop.f32.mrb[18].mxu1 }
 0x23e   : > { %v1921_v44 = vadd.f32 %v3227_v43, %v4058_v16  ;;  %v1912_v45 = vpop.f32.mrb[19].mxu1  ;;  %v2166_v46 = vmax.f32 %v1918_v17, 0.0 }
 0x23f   : > { %v1913_v18 = vadd.f32 %v4058_v16, %v1912_v45  ;;  %v2164_v48 = vmax.f32 %v1910_v42, 0.0 }
 0x240   : > { %v2167_v47 = vmax.f32 %v1921_v44, 0.0 }
 0x241   : > { %v2165_v49 = vmax.f32 %v1913_v18, 0.0 }
 0x242   : > { %v4078_v51 = vpack.c.bf16 %v2167_v47, %v2166_v46 }
 0x243   : > { %v4081_v52 = vpack.c.bf16 %v2165_v49, %v2164_v48  ;;  %v3230_v53 = vpop.f32.mrb[20].mxu1 }
 0x244   : > { %v1934_v21 = vadd.f32 %v3230_v53, %v4058_v16  ;;  %v1925_v55 = vpop.f32.mrb[21].mxu1 }
 0x245   : > { %v1926_v56 = vadd.f32 %v4058_v16, %v1925_v55  ;;  %v3231_v57 = vpop.f32.mrb[22].mxu1 }
 0x246   : > { %v1937_v22 = vadd.f32 %v3231_v57, %v4058_v16  ;;  %v1928_v59 = vpop.f32.mrb[23].mxu1  ;;  %v2170_v61 = vmax.f32 %v1934_v21, 0.0 }
 0x247   : > { %v1929_v60 = vadd.f32 %v4058_v16, %v1928_v59  ;;  %v2168_v0 = vmax.f32 %v1926_v56, 0.0 }
 0x248   : > { %v2171_v62 = vmax.f32 %v1937_v22, 0.0 }
 0x249   : > { %v2169_v24 = vmax.f32 %v1929_v60, 0.0 }
 0x24a   : > { %v4118_v26 = vpack.c.bf16 %v2171_v62, %v2170_v61 }
 0x24b   : > { %v4120_v1 = vpack.c.bf16 %v2169_v24, %v2168_v0  ;;  %v3234_v10 = vpop.f32.mrb[24].mxu1 }
 0x24c   : > { %v1950_v2 = vadd.f32 %v3234_v10, %v4058_v16  ;;  %v1941_v3 = vpop.f32.mrb[25].mxu1 }
 0x24d   : > { %v1942_v11 = vadd.f32 %v4058_v16, %v1941_v3  ;;  %v3235_v4 = vpop.f32.mrb[26].mxu1 }
 0x24e   : > { %v1953_v5 = vadd.f32 %v3235_v4, %v4058_v16  ;;  %v1944_v6 = vpop.f32.mrb[27].mxu1  ;;  %v2174_v9 = vmax.f32 %v1950_v2, 0.0 }
 0x24f   : > { %v1945_v8 = vadd.f32 %v4058_v16, %v1944_v6  ;;  %v2172_v30 = vmax.f32 %v1942_v11, 0.0 }
 0x250   : > { %v2175_v27 = vmax.f32 %v1953_v5, 0.0 }
 0x251   : > { %v2173_v31 = vmax.f32 %v1945_v8, 0.0 }
 0x252   : > { %v4140_v35 = vpack.c.bf16 %v2175_v27, %v2174_v9 }
 0x253   : > { %v4142_v39 = vpack.c.bf16 %v2173_v31, %v2172_v30  ;;  %v3238_v17 = vpop.f32.mrb[28].mxu1 }
 0x254   : > { %v1966_v41 = vadd.f32 %v3238_v17, %v4058_v16  ;;  %v1957_v42 = vpop.f32.mrb[29].mxu1 }
 0x255   : > { %v1958_v43 = vadd.f32 %v4058_v16, %v1957_v42  ;;  %v3239_v14 = vpop.f32.mrb[30].mxu1 }
 0x256   : > { %v1969_v44 = vadd.f32 %v3239_v14, %v4058_v16  ;;  %v1960_v32 = vpop.f32.mrb[31].mxu1  ;;  %v2178_v18 = vmax.f32 %v1966_v41, 0.0 }
 0x257   : > { %v1961_v45 = vadd.f32 %v4058_v16, %v1960_v32  ;;  %v2176_v19 = vmax.f32 %v1958_v43, 0.0 }
 0x258   : > { %v2179_v46 = vmax.f32 %v1969_v44, 0.0 }
 0x259   : > { %v2177_v48 = vmax.f32 %v1961_v45, 0.0 }
 0x25a   : > { %v4162_v50 = vpack.c.bf16 %v2179_v46, %v2178_v18 }
 0x25b   : > { %v4164_v20 = vpack.c.bf16 %v2177_v48, %v2176_v19  ;;  %v3242_v53 = vpop.f32.mrb[32].mxu1 }
 0x25c   : > { %v1982_v21 = vadd.f32 %v3242_v53, %v4058_v16  ;;  %v1973_v55 = vpop.f32.mrb[33].mxu1 }
 0x25d   : > { %v1974_v56 = vadd.f32 %v4058_v16, %v1973_v55  ;;  %v3243_v36 = vpop.f32.mrb[34].mxu1 }
 0x25e   : > { %v1985_v57 = vadd.f32 %v3243_v36, %v4058_v16  ;;  %v1976_v37 = vpop.f32.mrb[35].mxu1  ;;  %v2182_v22 = vmax.f32 %v1982_v21, 0.0 }
 0x25f   : > { %v1977_v54 = vadd.f32 %v4058_v16, %v1976_v37  ;;  %v2180_v60 = vmax.f32 %v1974_v56, 0.0 }
 0x260   : > { %v2183_v59 = vmax.f32 %v1985_v57, 0.0 }
 0x261   : > { %v2181_v61 = vmax.f32 %v1977_v54, 0.0 }
 0x262   : > { %v2385_v62 = vpack.c.bf16 %v2183_v59, %v2182_v22 }
 0x263   : > { %v2384_v0 = vpack.c.bf16 %v2181_v61, %v2180_v60  ;;  %v3246_v24 = vpop.f32.mrb[36].mxu1 }
 0x264   : > { %v1998_v10 = vadd.f32 %v3246_v24, %v4058_v16  ;;  %v1989_v2 = vpop.f32.mrb[37].mxu1 }
 0x265   : > { %v1990_v3 = vadd.f32 %v4058_v16, %v1989_v2  ;;  %v3247_v11 = vpop.f32.mrb[38].mxu1  ;;  %2996 = vmatprep.subr.bf16.mxu1 %v2384_v0 }
 0x266   : > { %v2001_v4 = vadd.f32 %v3247_v11, %v4058_v16  ;;  %v1992_v5 = vpop.f32.mrb[39].mxu1  ;;  %2997 = vmatpush3.bf16.msra.mxu1 %v4081_v52  ;;  %v2186_v8 = vmax.f32 %v1998_v10, 0.0 }
 0x267   : > { %v1993_v6 = vadd.f32 %v4058_v16, %v1992_v5  ;;  %2998 = vmatprep.subr.bf16.mxu1 %v2385_v62  ;;  %v2184_v27 = vmax.f32 %v1990_v3, 0.0 }
 0x268   : > { %v2187_v9 = vmax.f32 %v2001_v4, 0.0 }
 0x269   : > { %v2185_v30 = vmax.f32 %v1993_v6, 0.0 }
 0x26a   : > { %v2387_v31 = vpack.c.bf16 %v2187_v9, %v2186_v8  ;;  %2999 = vmatpush3.bf16.msra.mxu1 %v4078_v51 }
 0x26b   : > { %v2386_v17 = vpack.c.bf16 %v2185_v30, %v2184_v27  ;;  %v3250_v41 = vpop.f32.mrb[40].mxu1 }
 0x26c   : > { %v2014_v42 = vadd.f32 %v3250_v41, %v4058_v16  ;;  %v2005_v43 = vpop.f32.mrb[41].mxu1 }
 0x26d   : > { %v2006_v14 = vadd.f32 %v4058_v16, %v2005_v43  ;;  %v3251_v44 = vpop.f32.mrb[42].mxu1  ;;  %3000 = vmatprep.subr.bf16.mxu1 %v2386_v17 }
 0x26e   : > { %v2017_v52 = vadd.f32 %v3251_v44, %v4058_v16  ;;  %v2008_v32 = vpop.f32.mrb[43].mxu1  ;;  %3001 = vmatpush3.bf16.msra.mxu1 %v4120_v1  ;;  %v2190_v18 = vmax.f32 %v2014_v42, 0.0 }
 0x26f   : > { %v2009_v45 = vadd.f32 %v4058_v16, %v2008_v32  ;;  %3002 = vmatprep.subr.bf16.mxu1 %v2387_v31  ;;  %v2188_v51 = vmax.f32 %v2006_v14, 0.0 }
 0x270   : > { %v2191_v46 = vmax.f32 %v2017_v52, 0.0 }
 0x271   : > { %v2189_v19 = vmax.f32 %v2009_v45, 0.0 }
 0x272   : > { %v2389_v48 = vpack.c.bf16 %v2191_v46, %v2190_v18  ;;  %3003 = vmatpush3.bf16.msra.mxu1 %v4118_v26 }
 0x273   : > { %v2388_v53 = vpack.c.bf16 %v2189_v19, %v2188_v51  ;;  %v3254_v21 = vpop.f32.mrb[44].mxu1 }
 0x274   : > { %v2030_v55 = vadd.f32 %v3254_v21, %v4058_v16  ;;  %v2021_v56 = vpop.f32.mrb[45].mxu1 }
 0x275   : > { %v2022_v36 = vadd.f32 %v4058_v16, %v2021_v56  ;;  %v3255_v57 = vpop.f32.mrb[46].mxu1  ;;  %3004 = vmatprep.subr.bf16.mxu1 %v2388_v53 }
 0x276   : > { %v2033_v1 = vadd.f32 %v3255_v57, %v4058_v16  ;;  %v2024_v37 = vpop.f32.mrb[47].mxu1  ;;  %3005 = vmatpush3.bf16.msra.mxu1 %v4142_v39  ;;  %v2194_v22 = vmax.f32 %v2030_v55, 0.0 }
 0x277   : > { %v2025_v54 = vadd.f32 %v4058_v16, %v2024_v37  ;;  %3006 = vmatprep.subr.bf16.mxu1 %v2389_v48  ;;  %v2192_v26 = vmax.f32 %v2022_v36, 0.0 }
 0x278   : > { %v2195_v59 = vmax.f32 %v2033_v1, 0.0 }
 0x279   : > { %v2193_v60 = vmax.f32 %v2025_v54, 0.0 }
 0x27a   : > { %v2391_v61 = vpack.c.bf16 %v2195_v59, %v2194_v22  ;;  %3007 = vmatpush3.bf16.msra.mxu1 %v4140_v35 }
 0x27b   : > { %v2390_v62 = vpack.c.bf16 %v2193_v60, %v2192_v26  ;;  %v3258_v0 = vpop.f32.mrb[48].mxu1 }
 0x27c   : > { %v2046_v24 = vadd.f32 %v3258_v0, %v4058_v16  ;;  %v2037_v10 = vpop.f32.mrb[49].mxu1 }
 0x27d   : > { %v2038_v2 = vadd.f32 %v4058_v16, %v2037_v10  ;;  %v3259_v3 = vpop.f32.mrb[50].mxu1  ;;  %3008 = vmatprep.subr.bf16.mxu1 %v2390_v62 }
 0x27e   : > { %v2049_v39 = vadd.f32 %v3259_v3, %v4058_v16  ;;  %v2040_v11 = vpop.f32.mrb[51].mxu1  ;;  %3009 = vmatpush3.bf16.msra.mxu1 %v4164_v20  ;;  %v2198_v5 = vmax.f32 %v2046_v24, 0.0 }
 0x27f   : > { %v2041_v4 = vadd.f32 %v4058_v16, %v2040_v11  ;;  %3010 = vmatprep.subr.bf16.mxu1 %v2391_v61  ;;  %v2196_v35 = vmax.f32 %v2038_v2, 0.0 }
 0x280   : > { %v2199_v6 = vmax.f32 %v2049_v39, 0.0 }
 0x281   : > { %v2197_v8 = vmax.f32 %v2041_v4, 0.0 }
 0x282   : > { %v4193_v9 = vpack.c.bf16 %v2199_v6, %v2198_v5  ;;  %3011 = vmatpush3.bf16.msra.mxu1 %v4162_v50 }
 0x283   : > { %v4196_v27 = vpack.c.bf16 %v2197_v8, %v2196_v35  ;;  %v3262_v30 = vpop.f32.mrb[52].mxu1 }
 0x284   : > { %v2062_v31 = vadd.f32 %v3262_v30, %v4058_v16  ;;  %v2053_v17 = vpop.f32.mrb[53].mxu1 }
 0x285   : > { %v2054_v41 = vadd.f32 %v4058_v16, %v2053_v17  ;;  %v3263_v20 = vpop.f32.mrb[54].mxu1  ;;  %2855 = vmatmul.mubr.msk.bf16.vlgmr.msra.gmra.mrb[80].mxu1 %vm4009_vm6, %v3583_v7  ;;  %vm4423_vm6 = vnez %v4414_v25 }
 0x286   : > { %v2065_v42 = vadd.f32 %v3263_v20, %v4058_v16  ;;  %v2056_v43 = vpop.f32.mrb[55].mxu1  ;;  %2857 = vmatprep.mubr.msk.bf16.mxu1 %vm4021_vm9, %v3583_v7  ;;  %v2202_v14 = vmax.f32 %v2062_v31, 0.0  ;;  %vm4424_vm9 = vnez %v4416_v13 }
 0x287   : > { %v2057_v50 = vadd.f32 %v4058_v16, %v2056_v43  ;;  %v2200_v52 = vmax.f32 %v2054_v41, 0.0 }
 0x288   : > { %v2203_v44 = vmax.f32 %v2065_v42, 0.0 }
 0x289   : > { %v2201_v32 = vmax.f32 %v2057_v50, 0.0 }
 0x28a   : > { %v4208_v45 = vpack.c.bf16 %v2203_v44, %v2202_v14 }
 0x28b   : > { %v4210_v18 = vpack.c.bf16 %v2201_v32, %v2200_v52  ;;  %v3266_v46 = vpop.f32.mrb[56].mxu1 }
 0x28c   : > { %v2078_v12 = vadd.f32 %v3266_v46, %v4058_v16  ;;  %v2069_v51 = vpop.f32.mrb[57].mxu1 }
 0x28d   : > { %v2070_v19 = vadd.f32 %v4058_v16, %v2069_v51  ;;  %v3267_v48 = vpop.f32.mrb[58].mxu1  ;;  %2859 = vmatmul.mubr.msk.bf16.gmra.mrb[84].mxu1 %vm4027_vm12, %v3583_v7  ;;  %vm4425_vm12 = vnez %v4418_v34 }
 0x28e   : > { %v2081_v28 = vadd.f32 %v3267_v48, %v4058_v16  ;;  %v2072_v53 = vpop.f32.mrb[59].mxu1  ;;  %2861 = vmatprep.mubr.msk.bf16.mxu1 %vm4039_vm15, %v3583_v7  ;;  %v2206_v55 = vmax.f32 %v2078_v12, 0.0 }
 0x28f   : > { %v2073_v21 = vadd.f32 %v4058_v16, %v2072_v53  ;;  %v2204_v36 = vmax.f32 %v2070_v19, 0.0 }
 0x290   : > { %v2207_v56 = vmax.f32 %v2081_v28, 0.0 }
 0x291   : > { %v2205_v57 = vmax.f32 %v2073_v21, 0.0 }
 0x292   : > { %v4222_v1 = vpack.c.bf16 %v2207_v56, %v2206_v55 }
 0x293   : > { %v4224_v37 = vpack.c.bf16 %v2205_v57, %v2204_v36  ;;  %v3270_v54 = vpop.f32.mrb[60].mxu1 }
 0x294   : > { %v2094_v29 = vadd.f32 %v3270_v54, %v4058_v16  ;;  %v2085_v22 = vpop.f32.mrb[61].mxu1 }
 0x295   : > { %v2086_v59 = vadd.f32 %v4058_v16, %v2085_v22  ;;  %v3271_v26 = vpop.f32.mrb[62].mxu1  ;;  %2863 = vmatmul.mubr.msk.bf16.gmra.mrb[88].mxu1 %vm4045_vm2, %v3583_v7 }
 0x296   : > { %v2097_v33 = vadd.f32 %v3271_v26, %v4058_v16  ;;  %v2088_v60 = vpop.f32.mrb[63].mxu1  ;;  %2865 = vmatprep.mubr.msk.bf16.mxu1 %vm4062_vm5, %v3583_v7  ;;  %v2210_v62 = vmax.f32 %v2094_v29, 0.0 }
 0x297   : > { %v2089_v61 = vadd.f32 %v4058_v16, %v2088_v60  ;;  %v2208_v24 = vmax.f32 %v2086_v59, 0.0 }
 0x298   : > { %v2211_v0 = vmax.f32 %v2097_v33, 0.0 }
 0x299   : > { %v2209_v10 = vmax.f32 %v2089_v61, 0.0 }
 0x29a   : > { %v4236_v2 = vpack.c.bf16 %v2211_v0, %v2210_v62 }
 0x29b   : > { %v4238_v3 = vpack.c.bf16 %v2209_v10, %v2208_v24 }
 0x29d   : > { %v3274_v39 = vpop.f32.mrb[64].mxu1  ;;  %2867 = vmatmul.mubr.msk.bf16.gmra.mrb[92].mxu1 %vm4068_vm10, %v3583_v7 }
 0x29e   : > { %v2110_v15 = vadd.f32 %v3274_v39, %v4058_v16  ;;  %v2101_v11 = vpop.f32.mrb[65].mxu1  ;;  %2869 = vmatprep.mubr.msk.bf16.mxu1 %vm4090_vm14, %v3583_v7 }
 0x29f   : > { %v2102_v38 = vadd.f32 %v4058_v16, %v2101_v11  ;;  %v3275_v4 = vpop.f32.mrb[66].mxu1 }
 0x2a0   : > { %v2113_v5 = vadd.f32 %v3275_v4, %v4058_v16  ;;  %v2104_v6 = vpop.f32.mrb[67].mxu1  ;;  %v2214_v8 = vmax.f32 %v2110_v15, 0.0 }
 0x2a1   : > { %v2105_v35 = vadd.f32 %v4058_v16, %v2104_v6  ;;  %v2212_v31 = vmax.f32 %v2102_v38, 0.0 }
 0x2a2   : > { %v2215_v30 = vmax.f32 %v2113_v5, 0.0 }
 0x2a3   : > { %v2213_v40 = vmax.f32 %v2105_v35, 0.0 }
 0x2a4   : > { %v2401_v17 = vpack.c.bf16 %v2215_v30, %v2214_v8 }
 0x2a5   : > { %v2400_v41 = vpack.c.bf16 %v2213_v40, %v2212_v31  ;;  %v3278_v20 = vpop.f32.mrb[68].mxu1 }
 0x2a6   : > { %v2126_v42 = vadd.f32 %v3278_v20, %v4058_v16  ;;  %v2117_v43 = vpop.f32.mrb[69].mxu1 }
 0x2a7   : > { %v2118_v58 = vadd.f32 %v4058_v16, %v2117_v43  ;;  %v3279_v50 = vpop.f32.mrb[70].mxu1  ;;  %3036 = vmatprep.subr.bf16.mxu1 %v2400_v41 }
 0x2a8   : > { %v2129_v14 = vadd.f32 %v3279_v50, %v4058_v16  ;;  %v2120_v44 = vpop.f32.mrb[71].mxu1  ;;  %3037 = vmatpush3.bf16.msra.mxu1 %v4196_v27  ;;  %v2218_v32 = vmax.f32 %v2126_v42, 0.0 }
 0x2a9   : > { %v2121_v52 = vadd.f32 %v4058_v16, %v2120_v44  ;;  %3038 = vmatprep.subr.bf16.mxu1 %v2401_v17  ;;  %v2216_v12 = vmax.f32 %v2118_v58, 0.0 }
 0x2aa   : > { %v2219_v46 = vmax.f32 %v2129_v14, 0.0 }
 0x2ab   : > { %v2217_v51 = vmax.f32 %v2121_v52, 0.0 }
 0x2ac   : > { %v2403_v19 = vpack.c.bf16 %v2219_v46, %v2218_v32  ;;  %3039 = vmatpush3.bf16.msra.mxu1 %v4193_v9 }
 0x2ad   : > { %v2402_v48 = vpack.c.bf16 %v2217_v51, %v2216_v12  ;;  %v3282_v28 = vpop.f32.mrb[72].mxu1 }
 0x2ae   : > { %v2142_v53 = vadd.f32 %v3282_v28, %v4058_v16  ;;  %v2133_v21 = vpop.f32.mrb[73].mxu1 }
 0x2af   : > { %v2134_v55 = vadd.f32 %v4058_v16, %v2133_v21  ;;  %v3283_v56 = vpop.f32.mrb[74].mxu1  ;;  %3040 = vmatprep.subr.bf16.mxu1 %v2402_v48 }
 0x2b0   : > { %v2145_v27 = vadd.f32 %v3283_v56, %v4058_v16  ;;  %v2136_v36 = vpop.f32.mrb[75].mxu1  ;;  %3041 = vmatpush3.bf16.msra.mxu1 %v4210_v18  ;;  %v2222_v54 = vmax.f32 %v2142_v53, 0.0 }
 0x2b1   : > { %v2137_v57 = vadd.f32 %v4058_v16, %v2136_v36  ;;  %3042 = vmatprep.subr.bf16.mxu1 %v2403_v19  ;;  %v2220_v9 = vmax.f32 %v2134_v55, 0.0 }
 0x2b2   : > { %v2223_v29 = vmax.f32 %v2145_v27, 0.0 }
 0x2b3   : > { %v2221_v22 = vmax.f32 %v2137_v57, 0.0 }
 0x2b4   : > { %v2405_v59 = vpack.c.bf16 %v2223_v29, %v2222_v54  ;;  %3043 = vmatpush3.bf16.msra.mxu1 %v4208_v45 }
 0x2b5   : > { %v2404_v26 = vpack.c.bf16 %v2221_v22, %v2220_v9  ;;  %v3286_v33 = vpop.f32.mrb[76].mxu1 }
 0x2b6   : > { %v2158_v60 = vadd.f32 %v3286_v33, %v4058_v16  ;;  %v2149_v61 = vpop.f32.mrb[77].mxu1 }
 0x2b7   : > { %v2150_v62 = vadd.f32 %v4058_v16, %v2149_v61  ;;  %v3287_v0 = vpop.f32.mrb[78].mxu1  ;;  %3044 = vmatprep.subr.bf16.mxu1 %v2404_v26 }
 0x2b8   : > { %v2161_v18 = vadd.f32 %v3287_v0, %v4058_v16  ;;  %v2152_v24 = vpop.f32.mrb[79].mxu1  ;;  %3045 = vmatpush3.bf16.msra.mxu1 %v4224_v37  ;;  %v2226_v39 = vmax.f32 %v2158_v60, 0.0 }
 0x2b9   : > { %v2153_v10 = vadd.f32 %v4058_v16, %v2152_v24  ;;  %3046 = vmatprep.subr.bf16.mxu1 %v2405_v59  ;;  %v2224_v45 = vmax.f32 %v2150_v62, 0.0  ;;  %v3584_v16 = vmov 0.0  }
 0x2ba   : > { %v2227_v15 = vmax.f32 %v2161_v18, 0.0  ;;  %394 = vst [vmem:[%s4294_s10] sm:$0xff] %v3584_v16  ;;  %395 = vst [vmem:[%s4294_s10 + $0x8] sm:$0xff] %v3584_v16 }
 0x2bb   : > { %v2225_v11 = vmax.f32 %v2153_v10, 0.0  ;;  %396 = vst [vmem:[%s4294_s10 + $0x10] sm:$0xff] %v3584_v16  ;;  %397 = vst [vmem:[%s4294_s10 + $0x18] sm:$0xff] %v3584_v16 }
 0x2bc   : > { %v2407_v38 = vpack.c.bf16 %v2227_v15, %v2226_v39  ;;  %3047 = vmatpush3.bf16.msra.mxu1 %v4222_v1  ;;  %398 = vst [vmem:[%s4294_s10 + $0x20] sm:$0xff] %v3584_v16  ;;  %399 = vst [vmem:[%s4294_s10 + $0x28] sm:$0xff] %v3584_v16 }
 0x2bd   : > { %v2406_v4 = vpack.c.bf16 %v2225_v11, %v2224_v45  ;;  %400 = vst [vmem:[%s4294_s10 + $0x30] sm:$0xff] %v3584_v16  ;;  %401 = vst [vmem:[%s4294_s10 + $0x38] sm:$0xff] %v3584_v16 }
 0x2bf   : > { %3048 = vmatprep.subr.bf16.mxu1 %v2406_v4 }
 0x2c0   : > { %3049 = vmatpush3.bf16.msra.mxu1 %v4238_v3 }
 0x2c1   : > { %3050 = vmatprep.subr.bf16.mxu1 %v2407_v38 }
 0x2c4   : > { %3051 = vmatpush3.bf16.msra.mxu1 %v4236_v2  ;;  %v2539_v52 = vld [vmem:[%s4306_s24] sm:$0xff]  ;;  %v2540_v51 = vld [vmem:[%s4306_s24 + $0x8] sm:$0xff]  ;;  %v2541_v27 = vld [vmem:[%s4306_s24 + $0x10] sm:$0xff] }
 0x2c5   : > { %v2542_v29 = vld [vmem:[%s4306_s24 + $0x18] sm:$0xff]  ;;  %v2543_v62 = vld [vmem:[%s4306_s24 + $0x20] sm:$0xff]  ;;  %v2544_v10 = vld [vmem:[%s4306_s24 + $0x28] sm:$0xff] }
 0x2c7   : > { %2871 = vmatmul.mubr.msk.bf16.vlgmr.msra.gmra.mrb[96].mxu1 %vm4099_vm3, %v3583_v7 }
 0x2c8   : > { %2873 = vmatprep.mubr.msk.bf16.mxu1 %vm4106_vm8, %v3583_v7 }
 0x2cf   : > { %2875 = vmatmul.mubr.msk.bf16.gmra.mrb[100].mxu1 %vm4423_vm6, %v3583_v7 }
 0x2d0   : > { %2877 = vmatprep.mubr.msk.bf16.mxu1 %vm4424_vm9, %v3583_v7 }
 0x2d7   : > { %2879 = vmatmul.mubr.msk.bf16.gmra.mrb[104].mxu1 %vm4425_vm12, %v3583_v7 }
 0x2d8   : > { %2881 = vmatprep.mubr.msk.bf16.mxu1 %vm4150_vm11, %v3583_v7 }
 0x2df   : > { %2883 = vmatmul.mubr.msk.bf16.gmra.mrb[108].mxu1 %vm4158_vm7, %v3583_v7 }
 0x358   : > { %v3012_v7 = vpop.f32.mrb[80].mxu1 }
 0x359   : > { %v3013_v23 = vpop.f32.mrb[81].mxu1 }
 0x35a   : > { %v3014_v63 = vadd.f32 %v3013_v23, %v3012_v7  ;;  %v3015_v25 = vpop.f32.mrb[82].mxu1  ;;  %v2545_v7 = vld [vmem:[%s4306_s24 + $0x30] sm:$0xff] }
 0x35b   : > { %v3016_v13 = vpop.f32.mrb[83].mxu1 }
 0x35c   : > { %v3017_v34 = vadd.f32 %v3016_v13, %v3015_v25  ;;  %v2546_v13 = vld [vmem:[%s4306_s24 + $0x38] sm:$0xff] }
 0x360   : > { %v3018_v47 = vpop.f32.mrb[84].mxu1 }
 0x361   : > { %v3019_v49 = vpop.f32.mrb[85].mxu1 }
 0x362   : > { %v3020_v1 = vadd.f32 %v3019_v49, %v3018_v47  ;;  %v3021_v37 = vpop.f32.mrb[86].mxu1 }
 0x363   : > { %v3022_v2 = vpop.f32.mrb[87].mxu1 }
 0x364   : > { %v3023_v3 = vadd.f32 %v3022_v2, %v3021_v37 }
 0x368   : > { %v3024_v5 = vpop.f32.mrb[88].mxu1 }
 0x369   : > { %v3025_v6 = vpop.f32.mrb[89].mxu1 }
 0x36a   : > { %v3026_v35 = vadd.f32 %v3025_v6, %v3024_v5  ;;  %v3027_v8 = vpop.f32.mrb[90].mxu1 }
 0x36b   : > { %v3028_v30 = vpop.f32.mrb[91].mxu1 }
 0x36c   : > { %v3029_v31 = vadd.f32 %v3028_v30, %v3027_v8 }
 0x370   : > { %v3030_v40 = vpop.f32.mrb[92].mxu1 }
 0x371   : > { %v3031_v17 = vpop.f32.mrb[93].mxu1 }
 0x372   : > { %v3032_v41 = vadd.f32 %v3031_v17, %v3030_v40  ;;  %v3033_v20 = vpop.f32.mrb[94].mxu1 }
 0x373   : > { %v3034_v42 = vpop.f32.mrb[95].mxu1 }
 0x374   : > { %v3035_v43 = vadd.f32 %v3034_v42, %v3033_v20 }
 0x39a   : > { %v3052_v58 = vpop.f32.mrb[96].mxu1 }
 0x39b   : > { %v3053_v50 = vpop.f32.mrb[97].mxu1 }
 0x39c   : > { %v3054_v14 = vadd.f32 %v3053_v50, %v3052_v58  ;;  %v3055_v44 = vpop.f32.mrb[98].mxu1 }
 0x39d   : > { %v3056_v32 = vpop.f32.mrb[99].mxu1 }
 0x39e   : > { %v2508_v46 = vadd.f32 %v3054_v14, %v3014_v63  ;;  %v3057_v12 = vadd.f32 %v3056_v32, %v3055_v44 }
 0x3a0   : > { %v2547_v19 = vadd.f32 %v2539_v52, %v2508_v46  ;;  %v2511_v48 = vadd.f32 %v3057_v12, %v3017_v34 }
 0x3a2   : > { %2555 = vst [vmem:[%s4306_s24] sm:$0xff] %v2547_v19  ;;  %v2548_v28 = vadd.f32 %v2540_v51, %v2511_v48  ;;  %v3058_v53 = vpop.f32.mrb[100].mxu1 }
 0x3a3   : > { %v3059_v21 = vpop.f32.mrb[101].mxu1 }
 0x3a4   : > { %2556 = vst [vmem:[%s4306_s24 + $0x8] sm:$0xff] %v2548_v28  ;;  %v3060_v55 = vadd.f32 %v3059_v21, %v3058_v53  ;;  %v3061_v56 = vpop.f32.mrb[102].mxu1 }
 0x3a5   : > { %v3062_v36 = vpop.f32.mrb[103].mxu1 }
 0x3a6   : > { %v2516_v57 = vadd.f32 %v3060_v55, %v3020_v1  ;;  %v3063_v54 = vadd.f32 %v3062_v36, %v3061_v56 }
 0x3a8   : > { %v2549_v9 = vadd.f32 %v2541_v27, %v2516_v57  ;;  %v2519_v22 = vadd.f32 %v3063_v54, %v3023_v3 }
 0x3aa   : > { %2557 = vst [vmem:[%s4306_s24 + $0x10] sm:$0xff] %v2549_v9  ;;  %v2550_v59 = vadd.f32 %v2542_v29, %v2519_v22  ;;  %v3064_v26 = vpop.f32.mrb[104].mxu1 }
 0x3ab   : > { %v3065_v33 = vpop.f32.mrb[105].mxu1 }
 0x3ac   : > { %2558 = vst [vmem:[%s4306_s24 + $0x18] sm:$0xff] %v2550_v59  ;;  %v3066_v60 = vadd.f32 %v3065_v33, %v3064_v26  ;;  %v3067_v61 = vpop.f32.mrb[106].mxu1 }
 0x3ad   : > { %v3068_v0 = vpop.f32.mrb[107].mxu1 }
 0x3ae   : > { %v2524_v18 = vadd.f32 %v3066_v60, %v3026_v35  ;;  %v3069_v24 = vadd.f32 %v3068_v0, %v3067_v61 }
 0x3b0   : > { %v2551_v39 = vadd.f32 %v2543_v62, %v2524_v18  ;;  %v2527_v15 = vadd.f32 %v3069_v24, %v3029_v31 }
 0x3b2   : > { %2559 = vst [vmem:[%s4306_s24 + $0x20] sm:$0xff] %v2551_v39  ;;  %v2552_v45 = vadd.f32 %v2544_v10, %v2527_v15  ;;  %v3070_v11 = vpop.f32.mrb[108].mxu1 }
 0x3b3   : > { %v3071_v38 = vpop.f32.mrb[109].mxu1 }
 0x3b4   : > { %2560 = vst [vmem:[%s4306_s24 + $0x28] sm:$0xff] %v2552_v45  ;;  %v3072_v4 = vadd.f32 %v3071_v38, %v3070_v11  ;;  %v3073_v16 = vpop.f32.mrb[110].mxu1 }
 0x3b5   : > { %v3074_v23 = vpop.f32.mrb[111].mxu1 }
 0x3b6   : > { %v2532_v63 = vadd.f32 %v3072_v4, %v3032_v41  ;;  %v3075_v25 = vadd.f32 %v3074_v23, %v3073_v16 }
 0x3b8   : > { %v2553_v34 = vadd.f32 %v2545_v7, %v2532_v63  ;;  %v2535_v47 = vadd.f32 %v3075_v25, %v3035_v43 }
 0x3ba   : > { %2561 = vst [vmem:[%s4306_s24 + $0x30] sm:$0xff] %v2553_v34  ;;  %v2554_v49 = vadd.f32 %v2546_v13, %v2535_v47 }
 0x3bc   : > { %2562 = vst [vmem:[%s4306_s24 + $0x38] sm:$0xff] %v2554_v49 }
 0x3bd   : > { %3513 = shalt.err (!%p3510_p11)
}
 0x3be   : > { %s3514_s29 = scalar_lea.hbm %s4327_s20, 1024  ;;  %s3518_s11 = scalar_lea.hbm %s4390_s9, 2048 }
 0x3bf   : > { %p3515_p12 = scmp.ne.s32.totalorder %s4327_s20, %s3514_s29  ;;  %p3519_p2 = scmp.lt.u32.totalorder %s4327_s20, %s4390_s9 }
 0x3c0   : > { %p3520_p3 = scmp.lt.u32.totalorder %s3518_s11, %s3514_s29  ;;  %p3522_p5 = scmp.lt.u32.totalorder %s3514_s29, %s4327_s20 }
 0x3c1   : > { %p3516_p0 = pnand %p3515_p12, %p3681_p9 }
 0x3c2   : > { %p3521_p4 = por %p3520_p3, %p3519_p2 }
 0x3c3   : > { %p3517_p1 = pneg %p3516_p0 }
 0x3c4   : > { %p3523_p6 = por %p3522_p5, %p3521_p4 }
 0x3c6   : > { %p3524_p7 = pnand %p3523_p6, %p3517_p1 }
 0x3c8   : > { %3527 = shalt.err (!%p3524_p7)
}
 0x3c9   : > { %s3586_s16 = smov 128   ;;  %s3587_s27 = smov 8  }
 0x3ca   : > { %3354 = dma.vmem_to_hbm [thread:$0]  (%p3681_p9), %s4329_s12, 1024, %s4327_s20, %s4335_s22, %s3586_s16, %s3586_s16, %s3587_s27  }
 0x3cb PF: > { %p3360_p8 = scmp.ge.s32.totalorder %s3580_s18, 2  ;;  %s2592_s28 = sand.u32 1, %s3560_s14  }
 0x3cc   : > { %s2593_s30 = scalar_lea.sflag [#allocation5], %s2592_s28 }
 0x3cd   : > { %p3357_p10 = pnand %p3360_p8, %p3688_p13 }
 0x3cf   : > { %3555 = dma.done.wait (!%p3357_p10), %s2593_s30, 1024  }
 0x3d0   : > { %3557 = vsyncadd (!%p3357_p10), %s2593_s30, 4294966272  ;;  %s28_s18 = sadd.s32 1, %s3580_s18   ;;  %s4426_s14 = smov %s3564_s15 }
 0x3d1   : > { %p25_p11 = scmp.ge.s32.totalorder %s28_s18, 4   ;;  %s4427_s15 = smov %s3568_s0 }
 0x3d2   : > { %s4428_s0 = smov %s3694_s26  ;;  %s4429_s16 = smov %s3576_s17 }
 0x3d3   : > { %s4430_s17 = smov %s4432_s21  ;;  %27 = sbr.rel (!%p25_p11) target bundleno = 19 (0x13), region = 98 }
 0x3da   :  { %2598 = vsyncpa [#allocation5], 1 }
 0x3db   :  { %2600 = vsyncpa [#allocation5 + $0x1], 1 }

</bundles_post_ra>
